<compile_context>
chip_gen: v7x
topology: tpu7x:2x2x1
jax: 0.10.0
libtpu: 0.0.40
codegen_flags: <defaults>
</compile_context>

<pallas_src>
import functools

import jax
import jax.numpy as jnp
import numpy as np
from jax.experimental import pallas as pl
from jax.experimental.pallas import tpu as pltpu

EPS = 1e-5
LANE = 128
ACT_DTYPE = jnp.bfloat16      # MXU-input / stored-activation dtype


def _round_up(x, m):
    return (x + m - 1) // m * m


# ----------------------------------------------------------------------------
# Pallas kernels
# ----------------------------------------------------------------------------
def conv_bn_relu_kernel(p_ref, w_ref, shift_ref, o_ref):
    """relu(rows @ w + shift).  BN scale is pre-folded into w."""
    y = jnp.dot(p_ref[...], w_ref[...], preferred_element_type=jnp.float32)
    y = y + shift_ref[...]
    o_ref[...] = jnp.maximum(y, 0.0).astype(o_ref.dtype)


def conv_bn_add_relu_kernel(p_ref, w_ref, shift_ref, res_ref, o_ref):
    """relu(rows @ w + shift + residual)."""
    y = jnp.dot(p_ref[...], w_ref[...], preferred_element_type=jnp.float32)
    y = y + shift_ref[...] + res_ref[...].astype(jnp.float32)
    o_ref[...] = jnp.maximum(y, 0.0).astype(o_ref.dtype)


def conv8_shortcut_kernel(p_ref, w_ref, shift_ref, main_ref, sc_ref, *, cp):
    """Fused conv_8 (ReLU branch) + 1x1 shortcut (no ReLU); both use bn_8."""
    y = jnp.dot(p_ref[...], w_ref[...], preferred_element_type=jnp.float32)
    y = y + shift_ref[...]
    main_ref[...] = jnp.maximum(y[:, :cp], 0.0).astype(main_ref.dtype)
    sc_ref[...] = y[:, cp:].astype(sc_ref.dtype)


def gap_linear_kernel(x_ref, w_ref, b_ref, o_ref, *, inv_l):
    """Blocked GAP over L + Linear head; accumulates into the resident output."""
    @pl.when(pl.program_id(0) == 0)
    def _():
        o_ref[...] = jnp.zeros_like(o_ref)

    g = jnp.sum(x_ref[...].astype(jnp.float32), axis=1)            # (B, C)
    o_ref[...] += jnp.dot(g, w_ref[...], preferred_element_type=jnp.float32)

    @pl.when(pl.program_id(0) == pl.num_programs(0) - 1)
    def _():
        o_ref[...] = o_ref[...] * inv_l + b_ref[...]


# ----------------------------------------------------------------------------
# Wrapper helpers (tiling, VMEM budget, im2col, BN folding)
# ----------------------------------------------------------------------------
def _choose_row_tile(m, patch_width, elem_bytes=2, budget=4 << 20):
    """Largest row tile <=512 (multiple of 16) whose patch tile fits the budget."""
    tm = 512
    while tm > 16 and tm * patch_width * elem_bytes > budget:
        tm //= 2
    tm = min(tm, _round_up(m, 16))
    mp = _round_up(m, tm)
    return tm, mp


def _vmem_limit_bytes(*bufs):
    """bufs: (shape, dtype, n_buffers) triples -> explicit scoped-VMEM limit."""
    total = 0
    for shape, dtype, nbuf in bufs:
        n = 1
        for s in shape:
            n *= int(s)
        total += n * jnp.dtype(dtype).itemsize * nbuf
    # floor at 32 MiB (default on v6e/v7x, safe on v5e), cap at 48 MiB (v7x=64).
    return int(min(max(2 * total, 32 << 20), 48 << 20))


def _im2col(x_blc, K):
    """(B, L, C) -> (B*L, K*C) rows with PyTorch Conv1d 'same' padding."""
    B, L, C = x_blc.shape
    pad_l = (K - 1) // 2
    pad_r = (K - 1) - pad_l
    xp = jnp.pad(x_blc, ((0, 0), (pad_l, pad_r), (0, 0)))
    taps = [xp[:, k:k + L, :] for k in range(K)]                   # each (B, L, C)
    return jnp.concatenate(taps, axis=-1).reshape(B * L, K * C)


def _fold_bn_weight(w, b, bn, cin_pad, cout_pad):
    """Conv weight (Cout, Cin, K) + bias + BN -> ((K*cin_pad, cout_pad) bf16,
    (1, cout_pad) f32 shift).  Zero rows/cols handle channel padding."""
    cout, cin, K = w.shape
    gamma, beta, mean, var = bn
    scale = gamma / jnp.sqrt(var + EPS)
    wf = w * scale[:, None, None]                                  # fold BN scale
    shift = beta - mean * scale + b * scale                        # fold BN shift + bias
    wp = jnp.zeros((cout_pad, cin_pad, K), jnp.float32).at[:cout, :cin, :].set(wf)
    wm = jnp.transpose(wp, (2, 1, 0)).reshape(K * cin_pad, cout_pad)  # row = k*cin_pad + c
    sh = jnp.zeros((1, cout_pad), jnp.float32).at[:, :cout].set(shift[None, :])
    return wm.astype(ACT_DTYPE), sh


def _conv_matmul(patches, w_m, shift, *, residual=None, split_at=None,
                 out_dtype=ACT_DTYPE):
    """Row-tiled Pallas matmul: rows @ w_m + shift [+ residual], ReLU.

    split_at: columns [:split_at] are the ReLU'd main branch and [split_at:]
              the raw shortcut; returns (main, shortcut).
    """
    M, W = patches.shape
    N = w_m.shape[1]
    TM, Mp = _choose_row_tile(M, W)
    if Mp != M:
        patches = jnp.pad(patches, ((0, Mp - M), (0, 0)))
        if residual is not None:
            residual = jnp.pad(residual, ((0, Mp - M), (0, 0)))
    grid = (Mp // TM,)

    in_specs = [
        pl.BlockSpec((TM, W), lambda i: (i, 0)),       # im2col rows (streamed)
        pl.BlockSpec((W, N), lambda i: (0, 0)),        # folded weight (resident)
        pl.BlockSpec((1, N), lambda i: (0, 0)),        # BN shift (resident)
    ]
    args = [patches, w_m, shift]
    vmem_bufs = [((TM, W), patches.dtype, 2), ((W, N), w_m.dtype, 1),
                 ((1, N), shift.dtype, 1)]

    if split_at is not None:
        cp = split_at
        kern = functools.partial(conv8_shortcut_kernel, cp=cp)
        out_shape = (jax.ShapeDtypeStruct((Mp, cp), out_dtype),
                     jax.ShapeDtypeStruct((Mp, N - cp), out_dtype))
        out_specs = (pl.BlockSpec((TM, cp), lambda i: (i, 0)),
                     pl.BlockSpec((TM, N - cp), lambda i: (i, 0)))
        vmem_bufs += [((TM, cp), out_dtype, 2), ((TM, N - cp), out_dtype, 2)]
    elif residual is not None:
        kern = conv_bn_add_relu_kernel
        in_specs.append(pl.BlockSpec((TM, N), lambda i: (i, 0)))
        args.append(residual)
        out_shape = jax.ShapeDtypeStruct((Mp, N), out_dtype)
        out_specs = pl.BlockSpec((TM, N), lambda i: (i, 0))
        vmem_bufs += [((TM, N), residual.dtype, 2), ((TM, N), out_dtype, 2)]
    else:
        kern = conv_bn_relu_kernel
        out_shape = jax.ShapeDtypeStruct((Mp, N), out_dtype)
        out_specs = pl.BlockSpec((TM, N), lambda i: (i, 0))
        vmem_bufs += [((TM, N), out_dtype, 2)]

    out = pl.pallas_call(
        kern,
        out_shape=out_shape,
        grid=grid,
        in_specs=in_specs,
        out_specs=out_specs,
        compiler_params=pltpu.CompilerParams(
            dimension_semantics=("parallel",),
            vmem_limit_bytes=_vmem_limit_bytes(*vmem_bufs)),
    )(*args)

    if split_at is not None:
        return out[0][:M], out[1][:M]
    return out[:M]


# ----------------------------------------------------------------------------
# ResNet block / classifier forward
# ----------------------------------------------------------------------------
def resnet_block(x_blc, p, cin, cin_pad, cout, cout_pad):
    """x_blc: (B, L, cin_pad) rows-layout activations -> (B, L, cout_pad)."""
    B, L, _ = x_blc.shape

    # --- fused conv_8 + 1x1 shortcut (the module applies bn_8 to both) ---
    w8_m, sh8 = _fold_bn_weight(p["w8"], p["b8"], p["bn8"], cin_pad, cout_pad)
    # embed the kernel_size=1 shortcut at the center tap (pad_left = 3 for K=8)
    # so it shares conv_8's im2col patches.
    wsc8 = jnp.zeros((cout, cin, 8), jnp.float32).at[:, :, 3].set(p["wsc"][:, :, 0])
    wsc_m, shsc = _fold_bn_weight(wsc8, p["bsc"], p["bn8"], cin_pad, cout_pad)
    w_fused = jnp.concatenate([w8_m, wsc_m], axis=1)               # (8*cin_pad, 2*cout_pad)
    sh_fused = jnp.concatenate([sh8, shsc], axis=1)

    patches8 = _im2col(x_blc, 8)                                   # (B*L, 8*cin_pad)
    main, shortcut = _conv_matmul(patches8, w_fused, sh_fused, split_at=cout_pad)
    main = main.reshape(B, L, cout_pad)

    # --- conv_5 + bn_5 + relu ---
    w5_m, sh5 = _fold_bn_weight(p["w5"], p["b5"], p["bn5"], cout_pad, cout_pad)
    y5 = _conv_matmul(_im2col(main, 5), w5_m, sh5).reshape(B, L, cout_pad)

    # --- conv_3 (kernel_size=8 in the PyTorch module) + bn_3 + residual + relu ---
    w3_m, sh3 = _fold_bn_weight(p["w3"], p["b3"], p["bn3"], cout_pad, cout_pad)
    out = _conv_matmul(_im2col(y5, 8), w3_m, sh3, residual=shortcut)
    return out.reshape(B, L, cout_pad)


def resnet_classifier_forward(x, params):
    """x: (B, dim, L) NCL -> logits (B, n_out)."""
    B, dim, L = x.shape
    out_ch = params["block1"]["w8"].shape[0]
    c2 = out_ch * 2
    cp1 = _round_up(out_ch, LANE)
    cp2 = _round_up(c2, LANE)

    # single layout change: NCL -> rows (B, L, C); MXU inputs in bf16.
    o = jnp.transpose(x, (0, 2, 1)).astype(ACT_DTYPE)
    o = resnet_block(o, params["block1"], dim, dim, out_ch, cp1)
    o = resnet_block(o, params["block2"], out_ch, cp1, c2, cp2)
    o = resnet_block(o, params["block3"], c2, cp2, c2, cp2)        # (B, L, cp2)

    # --- GAP over L + Linear head (blocked reduction over L) ---
    n_out = params["fc_w"].shape[0]
    w = jnp.zeros((cp2, n_out), jnp.float32).at[:c2, :].set(params["fc_w"].T)
    bias = params["fc_b"].reshape(1, n_out).astype(jnp.float32)

    TL = 512
    while TL > 8 and B * TL * cp2 * 2 > (4 << 20):
        TL //= 2
    TL = min(TL, _round_up(L, 8))
    Lp = _round_up(L, TL)
    if Lp != L:
        o = jnp.pad(o, ((0, 0), (0, Lp - L), (0, 0)))

    kern = functools.partial(gap_linear_kernel, inv_l=1.0 / L)
    return pl.pallas_call(
        kern,
        out_shape=jax.ShapeDtypeStruct((B, n_out), jnp.float32),
        grid=(Lp // TL,),
        in_specs=[
            pl.BlockSpec((B, TL, cp2), lambda i: (0, i, 0)),
            pl.BlockSpec((cp2, n_out), lambda i: (0, 0)),
            pl.BlockSpec((1, n_out), lambda i: (0, 0)),
        ],
        out_specs=pl.BlockSpec((B, n_out), lambda i: (0, 0)),
        compiler_params=pltpu.CompilerParams(
            dimension_semantics=("arbitrary",),
            vmem_limit_bytes=_vmem_limit_bytes(
                ((B, TL, cp2), ACT_DTYPE, 2), ((cp2, n_out), jnp.float32, 1),
                ((1, n_out), jnp.float32, 1), ((B, n_out), jnp.float32, 2))),
    )(o, w, bias)


# ----------------------------------------------------------------------------
# Deterministic parameter initialization
# ----------------------------------------------------------------------------
def _init_conv(key, cout, cin, k):
    kw, kb = jax.random.split(key)
    w = 0.1 * jax.random.normal(kw, (cout, cin, k), jnp.float32)
    b = 0.1 * jax.random.normal(kb, (cout,), jnp.float32)
    return w, b


def _init_bn(key, c):
    k1, k2, k3, k4 = jax.random.split(key, 4)
    gamma = 1.0 + 0.1 * jax.random.normal(k1, (c,), jnp.float32)
    beta = 0.1 * jax.random.normal(k2, (c,), jnp.float32)
    mean = 0.1 * jax.random.normal(k3, (c,), jnp.float32)
    var = 1.0 + 0.1 * jnp.abs(jax.random.normal(k4, (c,), jnp.float32))
    return (gamma, beta, mean, var)


def _init_block(key, cin, cout):
    ks = jax.random.split(key, 7)
    w8, b8 = _init_conv(ks[0], cout, cin, 8)
    w5, b5 = _init_conv(ks[1], cout, cout, 5)
    w3, b3 = _init_conv(ks[2], cout, cout, 8)   # conv_3 actually has kernel_size=8
    wsc, bsc = _init_conv(ks[3], cout, cin, 1)
    return dict(w8=w8, b8=b8, w5=w5, b5=b5, w3=w3, b3=b3, wsc=wsc, bsc=bsc,
                bn8=_init_bn(ks[4], cout), bn5=_init_bn(ks[5], cout),
                bn3=_init_bn(ks[6], cout))


def init_params(key, dim, out_ch, num_classes):
    k1, k2, k3, k4 = jax.random.split(key, 4)
    n_out = num_classes if num_classes > 2 else 1
    kw, kb = jax.random.split(k4)
    return dict(
        block1=_init_block(k1, dim, out_ch),
        block2=_init_block(k2, out_ch, out_ch * 2),
        block3=_init_block(k3, out_ch * 2, out_ch * 2),
        fc_w=0.1 * jax.random.normal(kw, (n_out, out_ch * 2), jnp.float32),
        fc_b=0.1 * jax.random.normal(kb, (n_out,), jnp.float32),
    )


# ----------------------------------------------------------------------------
# Pure-JAX float32 reference (sanity check)
# ----------------------------------------------------------------------------
def _ref_conv_bn(x, w, b, bn, relu):
    K = w.shape[-1]
    pl_, pr_ = (K - 1) // 2, (K - 1) - (K - 1) // 2
    y = jax.lax.conv_general_dilated(x, w, (1,), [(pl_, pr_)],
                                     dimension_numbers=("NCH", "OIH", "NCH"))
    y = y + b[None, :, None]
    g, bt, m, v = bn
    y = g[None, :, None] * (y - m[None, :, None]) / jnp.sqrt(v[None, :, None] + EPS) \
        + bt[None, :, None]
    return jnp.maximum(y, 0.0) if relu else y


def _ref_block(x, p):
    cx = _ref_conv_bn(x, p["w8"], p["b8"], p["bn8"], True)
    cy = _ref_conv_bn(cx, p["w5"], p["b5"], p["bn5"], True)
    cz = _ref_conv_bn(cy, p["w3"], p["b3"], p["bn3"], False)
    sc = _ref_conv_bn(x, p["wsc"], p["bsc"], p["bn8"], False)
    return jnp.maximum(cz + sc, 0.0)


def _ref_forward(x, params):
    o = x
    for name in ("block1", "block2", "block3"):
        o = _ref_block(o, params[name])
    g = jnp.mean(o, axis=2)
    return g @ params["fc_w"].T + params["fc_b"]


# ----------------------------------------------------------------------------
if __name__ == "__main__":
    B, DIM, L = 2, 4, 16          # batch, dimension_num, sequence length
    OUT_CH, NUM_CLASSES = 8, 5    # out_channels, num_classes (>2 -> 5 logits)

    key = jax.random.PRNGKey(0)
    kx, kp = jax.random.split(key)
    x = jax.random.normal(kx, (B, DIM, L), jnp.float32)   # NCL, like PyTorch Conv1d
    params = init_params(kp, DIM, OUT_CH, NUM_CLASSES)

    fwd = jax.jit(resnet_classifier_forward)
    out = jax.block_until_ready(fwd(x, params))
    ref = jax.block_until_ready(_ref_forward(x, params))

    assert out.shape == (B, NUM_CLASSES), out.shape
    # tolerance accounts for bf16 MXU inputs / bf16 stored activations through
    # 9 conv layers (f32 accumulation); real indexing/semantics bugs produce
    # errors orders of magnitude larger than this.
    np.testing.assert_allclose(np.asarray(out), np.asarray(ref),
                               rtol=5e-2, atol=5e-2)
    print("KERNEL_OK")
</pallas_src>

<mosaic_0001>
module attributes {stable_mosaic.version = 11 : i64} {
  func.func @conv8_shortcut_kernel(%arg0: i32, %arg1: memref<32x32xbf16, #tpu.memory_space<vmem>>, %arg2: memref<32x256xbf16, #tpu.memory_space<vmem>>, %arg3: memref<1x256xf32, #tpu.memory_space<vmem>>, %arg4: memref<32x128xbf16, #tpu.memory_space<vmem>>, %arg5: memref<32x128xbf16, #tpu.memory_space<vmem>>) attributes {dimension_semantics = [#tpu.dimension_semantics<parallel>], iteration_bounds = array<i64: 1>, scalar_prefetch = 0 : i64, scratch_operands = 0 : i64, tpu.core_type = #tpu.core_type<tc>, window_params = [{transform_indices = @transform_0, window_bounds = array<i64: 32, 32>}, {pipeline_mode = #tpu.pipeline_mode<synchronous>, transform_indices = @transform_1, window_bounds = array<i64: 32, 256>}, {pipeline_mode = #tpu.pipeline_mode<synchronous>, transform_indices = @transform_2, window_bounds = array<i64: 1, 256>}, {transform_indices = @transform_3, window_bounds = array<i64: 32, 128>}, {transform_indices = @transform_4, window_bounds = array<i64: 32, 128>}]} {
    %c0 = arith.constant 0 : index
    %c0_0 = arith.constant 0 : index
    %0 = vector.load %arg1[%c0, %c0_0] : memref<32x32xbf16, #tpu.memory_space<vmem>>, vector<32x32xbf16>
    %c0_1 = arith.constant 0 : index
    %c0_2 = arith.constant 0 : index
    %1 = vector.load %arg2[%c0_1, %c0_2] : memref<32x256xbf16, #tpu.memory_space<vmem>>, vector<32x256xbf16>
    %cst = arith.constant dense<0.000000e+00> : vector<32x256xf32>
    %2 = tpu.matmul %0, %1, %cst {dimension_numbers = #tpu.dot_dimension_numbers<[1], [0], [0], [1], [0, 0, 1, 1], [], []>} : vector<32x32xbf16>, vector<32x256xbf16>, vector<32x256xf32> -> vector<32x256xf32>
    %c0_3 = arith.constant 0 : index
    %c0_4 = arith.constant 0 : index
    %3 = vector.load %arg3[%c0_3, %c0_4] : memref<1x256xf32, #tpu.memory_space<vmem>>, vector<1x256xf32>
    %4 = vector.broadcast %3 : vector<1x256xf32> to vector<32x256xf32>
    %5 = arith.addf %2, %4 : vector<32x256xf32>
    %6 = vector.extract_strided_slice %5 {offsets = [0, 0], sizes = [32, 128], strides = [1, 1]} : vector<32x256xf32> to vector<32x128xf32>
    %cst_5 = arith.constant 0.000000e+00 : f32
    %7 = vector.broadcast %cst_5 : f32 to vector<32x128xf32>
    %8 = arith.maximumf %6, %7 : vector<32x128xf32>
    %9 = arith.truncf %8 : vector<32x128xf32> to vector<32x128xbf16>
    %c0_6 = arith.constant 0 : index
    %c0_7 = arith.constant 0 : index
    %10 = vector.load %arg4[%c0_6, %c0_7] : memref<32x128xbf16, #tpu.memory_space<vmem>>, vector<32x128xbf16>
    tpu.vector_store %arg4[%c0_6, %c0_7], %9 {strides = array<i32>} : memref<32x128xbf16, #tpu.memory_space<vmem>>, vector<32x128xbf16>,
    %11 = vector.extract_strided_slice %5 {offsets = [0, 128], sizes = [32, 128], strides = [1, 1]} : vector<32x256xf32> to vector<32x128xf32>
    %12 = arith.truncf %11 : vector<32x128xf32> to vector<32x128xbf16>
    %c0_8 = arith.constant 0 : index
    %c0_9 = arith.constant 0 : index
    %13 = vector.load %arg5[%c0_8, %c0_9] : memref<32x128xbf16, #tpu.memory_space<vmem>>, vector<32x128xbf16>
    tpu.vector_store %arg5[%c0_8, %c0_9], %12 {strides = array<i32>} : memref<32x128xbf16, #tpu.memory_space<vmem>>, vector<32x128xbf16>,
    return
  }
  func.func @transform_0(%arg0: i32) -> (i32, i32) {
    %c0_i32 = arith.constant 0 : i32
    %c0_i32_0 = arith.constant 0 : i32
    return %arg0, %c0_i32 : i32, i32
  }
  func.func @transform_1(%arg0: i32) -> (i32, i32) {
    %c0_i32 = arith.constant 0 : i32
    %c0_i32_0 = arith.constant 0 : i32
    %c0_i32_1 = arith.constant 0 : i32
    return %c0_i32, %c0_i32_0 : i32, i32
  }
  func.func @transform_2(%arg0: i32) -> (i32, i32) {
    %c0_i32 = arith.constant 0 : i32
    %c0_i32_0 = arith.constant 0 : i32
    %c0_i32_1 = arith.constant 0 : i32
    return %c0_i32, %c0_i32_0 : i32, i32
  }
  func.func @transform_3(%arg0: i32) -> (i32, i32) {
    %c0_i32 = arith.constant 0 : i32
    %c0_i32_0 = arith.constant 0 : i32
    return %arg0, %c0_i32 : i32, i32
  }
  func.func @transform_4(%arg0: i32) -> (i32, i32) {
    %c0_i32 = arith.constant 0 : i32
    %c0_i32_0 = arith.constant 0 : i32
    return %arg0, %c0_i32 : i32, i32
  }
}

module attributes {stable_mosaic.version = 11 : i64} {
  func.func @conv_bn_relu_kernel(%arg0: i32, %arg1: memref<32x640xbf16, #tpu.memory_space<vmem>>, %arg2: memref<640x128xbf16, #tpu.memory_space<vmem>>, %arg3: memref<1x128xf32, #tpu.memory_space<vmem>>, %arg4: memref<32x128xbf16, #tpu.memory_space<vmem>>) attributes {dimension_semantics = [#tpu.dimension_semantics<parallel>], iteration_bounds = array<i64: 1>, scalar_prefetch = 0 : i64, scratch_operands = 0 : i64, tpu.core_type = #tpu.core_type<tc>, window_params = [{transform_indices = @transform_0, window_bounds = array<i64: 32, 640>}, {pipeline_mode = #tpu.pipeline_mode<synchronous>, transform_indices = @transform_1, window_bounds = array<i64: 640, 128>}, {pipeline_mode = #tpu.pipeline_mode<synchronous>, transform_indices = @transform_2, window_bounds = array<i64: 1, 128>}, {transform_indices = @transform_3, window_bounds = array<i64: 32, 128>}]} {
    %c0 = arith.constant 0 : index
    %c0_0 = arith.constant 0 : index
    %0 = vector.load %arg1[%c0, %c0_0] : memref<32x640xbf16, #tpu.memory_space<vmem>>, vector<32x640xbf16>
    %c0_1 = arith.constant 0 : index
    %c0_2 = arith.constant 0 : index
    %1 = vector.load %arg2[%c0_1, %c0_2] : memref<640x128xbf16, #tpu.memory_space<vmem>>, vector<640x128xbf16>
    %cst = arith.constant dense<0.000000e+00> : vector<32x128xf32>
    %2 = tpu.matmul %0, %1, %cst {dimension_numbers = #tpu.dot_dimension_numbers<[1], [0], [0], [1], [0, 0, 1, 1], [], []>} : vector<32x640xbf16>, vector<640x128xbf16>, vector<32x128xf32> -> vector<32x128xf32>
    %c0_3 = arith.constant 0 : index
    %c0_4 = arith.constant 0 : index
    %3 = vector.load %arg3[%c0_3, %c0_4] : memref<1x128xf32, #tpu.memory_space<vmem>>, vector<1x128xf32>
    %4 = vector.broadcast %3 : vector<1x128xf32> to vector<32x128xf32>
    %5 = arith.addf %2, %4 : vector<32x128xf32>
    %cst_5 = arith.constant 0.000000e+00 : f32
    %6 = vector.broadcast %cst_5 : f32 to vector<32x128xf32>
    %7 = arith.maximumf %5, %6 : vector<32x128xf32>
    %8 = arith.truncf %7 : vector<32x128xf32> to vector<32x128xbf16>
    %c0_6 = arith.constant 0 : index
    %c0_7 = arith.constant 0 : index
    %9 = vector.load %arg4[%c0_6, %c0_7] : memref<32x128xbf16, #tpu.memory_space<vmem>>, vector<32x128xbf16>
    tpu.vector_store %arg4[%c0_6, %c0_7], %8 {strides = array<i32>} : memref<32x128xbf16, #tpu.memory_space<vmem>>, vector<32x128xbf16>,
    return
  }
  func.func @transform_0(%arg0: i32) -> (i32, i32) {
    %c0_i32 = arith.constant 0 : i32
    %c0_i32_0 = arith.constant 0 : i32
    return %arg0, %c0_i32 : i32, i32
  }
  func.func @transform_1(%arg0: i32) -> (i32, i32) {
    %c0_i32 = arith.constant 0 : i32
    %c0_i32_0 = arith.constant 0 : i32
    %c0_i32_1 = arith.constant 0 : i32
    return %c0_i32, %c0_i32_0 : i32, i32
  }
  func.func @transform_2(%arg0: i32) -> (i32, i32) {
    %c0_i32 = arith.constant 0 : i32
    %c0_i32_0 = arith.constant 0 : i32
    %c0_i32_1 = arith.constant 0 : i32
    return %c0_i32, %c0_i32_0 : i32, i32
  }
  func.func @transform_3(%arg0: i32) -> (i32, i32) {
    %c0_i32 = arith.constant 0 : i32
    %c0_i32_0 = arith.constant 0 : i32
    return %arg0, %c0_i32 : i32, i32
  }
}

module attributes {stable_mosaic.version = 11 : i64} {
  func.func @conv_bn_add_relu_kernel(%arg0: i32, %arg1: memref<32x1024xbf16, #tpu.memory_space<vmem>>, %arg2: memref<1024x128xbf16, #tpu.memory_space<vmem>>, %arg3: memref<1x128xf32, #tpu.memory_space<vmem>>, %arg4: memref<32x128xbf16, #tpu.memory_space<vmem>>, %arg5: memref<32x128xbf16, #tpu.memory_space<vmem>>) attributes {dimension_semantics = [#tpu.dimension_semantics<parallel>], iteration_bounds = array<i64: 1>, scalar_prefetch = 0 : i64, scratch_operands = 0 : i64, tpu.core_type = #tpu.core_type<tc>, window_params = [{transform_indices = @transform_0, window_bounds = array<i64: 32, 1024>}, {pipeline_mode = #tpu.pipeline_mode<synchronous>, transform_indices = @transform_1, window_bounds = array<i64: 1024, 128>}, {pipeline_mode = #tpu.pipeline_mode<synchronous>, transform_indices = @transform_2, window_bounds = array<i64: 1, 128>}, {transform_indices = @transform_3, window_bounds = array<i64: 32, 128>}, {transform_indices = @transform_4, window_bounds = array<i64: 32, 128>}]} {
    %c0 = arith.constant 0 : index
    %c0_0 = arith.constant 0 : index
    %0 = vector.load %arg1[%c0, %c0_0] : memref<32x1024xbf16, #tpu.memory_space<vmem>>, vector<32x1024xbf16>
    %c0_1 = arith.constant 0 : index
    %c0_2 = arith.constant 0 : index
    %1 = vector.load %arg2[%c0_1, %c0_2] : memref<1024x128xbf16, #tpu.memory_space<vmem>>, vector<1024x128xbf16>
    %cst = arith.constant dense<0.000000e+00> : vector<32x128xf32>
    %2 = tpu.matmul %0, %1, %cst {dimension_numbers = #tpu.dot_dimension_numbers<[1], [0], [0], [1], [0, 0, 1, 1], [], []>} : vector<32x1024xbf16>, vector<1024x128xbf16>, vector<32x128xf32> -> vector<32x128xf32>
    %c0_3 = arith.constant 0 : index
    %c0_4 = arith.constant 0 : index
    %3 = vector.load %arg3[%c0_3, %c0_4] : memref<1x128xf32, #tpu.memory_space<vmem>>, vector<1x128xf32>
    %4 = vector.broadcast %3 : vector<1x128xf32> to vector<32x128xf32>
    %5 = arith.addf %2, %4 : vector<32x128xf32>
    %c0_5 = arith.constant 0 : index
    %c0_6 = arith.constant 0 : index
    %6 = vector.load %arg4[%c0_5, %c0_6] : memref<32x128xbf16, #tpu.memory_space<vmem>>, vector<32x128xbf16>
    %7 = arith.extf %6 : vector<32x128xbf16> to vector<32x128xf32>
    %8 = arith.addf %5, %7 : vector<32x128xf32>
    %cst_7 = arith.constant 0.000000e+00 : f32
    %9 = vector.broadcast %cst_7 : f32 to vector<32x128xf32>
    %10 = arith.maximumf %8, %9 : vector<32x128xf32>
    %11 = arith.truncf %10 : vector<32x128xf32> to vector<32x128xbf16>
    %c0_8 = arith.constant 0 : index
    %c0_9 = arith.constant 0 : index
    %12 = vector.load %arg5[%c0_8, %c0_9] : memref<32x128xbf16, #tpu.memory_space<vmem>>, vector<32x128xbf16>
    tpu.vector_store %arg5[%c0_8, %c0_9], %11 {strides = array<i32>} : memref<32x128xbf16, #tpu.memory_space<vmem>>, vector<32x128xbf16>,
    return
  }
  func.func @transform_0(%arg0: i32) -> (i32, i32) {
    %c0_i32 = arith.constant 0 : i32
    %c0_i32_0 = arith.constant 0 : i32
    return %arg0, %c0_i32 : i32, i32
  }
  func.func @transform_1(%arg0: i32) -> (i32, i32) {
    %c0_i32 = arith.constant 0 : i32
    %c0_i32_0 = arith.constant 0 : i32
    %c0_i32_1 = arith.constant 0 : i32
    return %c0_i32, %c0_i32_0 : i32, i32
  }
  func.func @transform_2(%arg0: i32) -> (i32, i32) {
    %c0_i32 = arith.constant 0 : i32
    %c0_i32_0 = arith.constant 0 : i32
    %c0_i32_1 = arith.constant 0 : i32
    return %c0_i32, %c0_i32_0 : i32, i32
  }
  func.func @transform_3(%arg0: i32) -> (i32, i32) {
    %c0_i32 = arith.constant 0 : i32
    %c0_i32_0 = arith.constant 0 : i32
    return %arg0, %c0_i32 : i32, i32
  }
  func.func @transform_4(%arg0: i32) -> (i32, i32) {
    %c0_i32 = arith.constant 0 : i32
    %c0_i32_0 = arith.constant 0 : i32
    return %arg0, %c0_i32 : i32, i32
  }
}

module attributes {stable_mosaic.version = 11 : i64} {
  func.func @conv8_shortcut_kernel(%arg0: i32, %arg1: memref<32x1024xbf16, #tpu.memory_space<vmem>>, %arg2: memref<1024x256xbf16, #tpu.memory_space<vmem>>, %arg3: memref<1x256xf32, #tpu.memory_space<vmem>>, %arg4: memref<32x128xbf16, #tpu.memory_space<vmem>>, %arg5: memref<32x128xbf16, #tpu.memory_space<vmem>>) attributes {dimension_semantics = [#tpu.dimension_semantics<parallel>], iteration_bounds = array<i64: 1>, scalar_prefetch = 0 : i64, scratch_operands = 0 : i64, tpu.core_type = #tpu.core_type<tc>, window_params = [{transform_indices = @transform_0, window_bounds = array<i64: 32, 1024>}, {pipeline_mode = #tpu.pipeline_mode<synchronous>, transform_indices = @transform_1, window_bounds = array<i64: 1024, 256>}, {pipeline_mode = #tpu.pipeline_mode<synchronous>, transform_indices = @transform_2, window_bounds = array<i64: 1, 256>}, {transform_indices = @transform_3, window_bounds = array<i64: 32, 128>}, {transform_indices = @transform_4, window_bounds = array<i64: 32, 128>}]} {
    %c0 = arith.constant 0 : index
    %c0_0 = arith.constant 0 : index
    %0 = vector.load %arg1[%c0, %c0_0] : memref<32x1024xbf16, #tpu.memory_space<vmem>>, vector<32x1024xbf16>
    %c0_1 = arith.constant 0 : index
    %c0_2 = arith.constant 0 : index
    %1 = vector.load %arg2[%c0_1, %c0_2] : memref<1024x256xbf16, #tpu.memory_space<vmem>>, vector<1024x256xbf16>
    %cst = arith.constant dense<0.000000e+00> : vector<32x256xf32>
    %2 = tpu.matmul %0, %1, %cst {dimension_numbers = #tpu.dot_dimension_numbers<[1], [0], [0], [1], [0, 0, 1, 1], [], []>} : vector<32x1024xbf16>, vector<1024x256xbf16>, vector<32x256xf32> -> vector<32x256xf32>
    %c0_3 = arith.constant 0 : index
    %c0_4 = arith.constant 0 : index
    %3 = vector.load %arg3[%c0_3, %c0_4] : memref<1x256xf32, #tpu.memory_space<vmem>>, vector<1x256xf32>
    %4 = vector.broadcast %3 : vector<1x256xf32> to vector<32x256xf32>
    %5 = arith.addf %2, %4 : vector<32x256xf32>
    %6 = vector.extract_strided_slice %5 {offsets = [0, 0], sizes = [32, 128], strides = [1, 1]} : vector<32x256xf32> to vector<32x128xf32>
    %cst_5 = arith.constant 0.000000e+00 : f32
    %7 = vector.broadcast %cst_5 : f32 to vector<32x128xf32>
    %8 = arith.maximumf %6, %7 : vector<32x128xf32>
    %9 = arith.truncf %8 : vector<32x128xf32> to vector<32x128xbf16>
    %c0_6 = arith.constant 0 : index
    %c0_7 = arith.constant 0 : index
    %10 = vector.load %arg4[%c0_6, %c0_7] : memref<32x128xbf16, #tpu.memory_space<vmem>>, vector<32x128xbf16>
    tpu.vector_store %arg4[%c0_6, %c0_7], %9 {strides = array<i32>} : memref<32x128xbf16, #tpu.memory_space<vmem>>, vector<32x128xbf16>,
    %11 = vector.extract_strided_slice %5 {offsets = [0, 128], sizes = [32, 128], strides = [1, 1]} : vector<32x256xf32> to vector<32x128xf32>
    %12 = arith.truncf %11 : vector<32x128xf32> to vector<32x128xbf16>
    %c0_8 = arith.constant 0 : index
    %c0_9 = arith.constant 0 : index
    %13 = vector.load %arg5[%c0_8, %c0_9] : memref<32x128xbf16, #tpu.memory_space<vmem>>, vector<32x128xbf16>
    tpu.vector_store %arg5[%c0_8, %c0_9], %12 {strides = array<i32>} : memref<32x128xbf16, #tpu.memory_space<vmem>>, vector<32x128xbf16>,
    return
  }
  func.func @transform_0(%arg0: i32) -> (i32, i32) {
    %c0_i32 = arith.constant 0 : i32
    %c0_i32_0 = arith.constant 0 : i32
    return %arg0, %c0_i32 : i32, i32
  }
  func.func @transform_1(%arg0: i32) -> (i32, i32) {
    %c0_i32 = arith.constant 0 : i32
    %c0_i32_0 = arith.constant 0 : i32
    %c0_i32_1 = arith.constant 0 : i32
    return %c0_i32, %c0_i32_0 : i32, i32
  }
  func.func @transform_2(%arg0: i32) -> (i32, i32) {
    %c0_i32 = arith.constant 0 : i32
    %c0_i32_0 = arith.constant 0 : i32
    %c0_i32_1 = arith.constant 0 : i32
    return %c0_i32, %c0_i32_0 : i32, i32
  }
  func.func @transform_3(%arg0: i32) -> (i32, i32) {
    %c0_i32 = arith.constant 0 : i32
    %c0_i32_0 = arith.constant 0 : i32
    return %arg0, %c0_i32 : i32, i32
  }
  func.func @transform_4(%arg0: i32) -> (i32, i32) {
    %c0_i32 = arith.constant 0 : i32
    %c0_i32_0 = arith.constant 0 : i32
    return %arg0, %c0_i32 : i32, i32
  }
}

module attributes {stable_mosaic.version = 11 : i64} {
  func.func @gap_linear_kernel(%arg0: i32, %arg1: memref<2x16x128xbf16, #tpu.memory_space<vmem>>, %arg2: memref<128x5xf32, #tpu.memory_space<vmem>>, %arg3: memref<1x5xf32, #tpu.memory_space<vmem>>, %arg4: memref<2x5xf32, #tpu.memory_space<vmem>>) attributes {dimension_semantics = [#tpu.dimension_semantics<arbitrary>], iteration_bounds = array<i64: 1>, scalar_prefetch = 0 : i64, scratch_operands = 0 : i64, tpu.core_type = #tpu.core_type<tc>, window_params = [{transform_indices = @transform_0, window_bounds = array<i64: 2, 16, 128>}, {pipeline_mode = #tpu.pipeline_mode<synchronous>, transform_indices = @transform_1, window_bounds = array<i64: 128, 5>}, {pipeline_mode = #tpu.pipeline_mode<synchronous>, transform_indices = @transform_2, window_bounds = array<i64: 1, 5>}, {pipeline_mode = #tpu.pipeline_mode<synchronous>, transform_indices = @transform_3, window_bounds = array<i64: 2, 5>}]} {
    %c0_i32 = arith.constant 0 : i32
    %0 = arith.cmpi eq, %arg0, %c0_i32 : i32
    %1 = arith.extui %0 : i1 to i32
    %c0_i32_0 = arith.constant 0 : i32
    %2 = arith.cmpi ne, %1, %c0_i32_0 : i32
    scf.if %2 {
      %cst_12 = arith.constant 0.000000e+00 : f32
      %14 = vector.broadcast %cst_12 : f32 to vector<2x5xf32>
      %c0_13 = arith.constant 0 : index
      %c0_14 = arith.constant 0 : index
      %15 = vector.load %arg4[%c0_13, %c0_14] : memref<2x5xf32, #tpu.memory_space<vmem>>, vector<2x5xf32>
      tpu.vector_store %arg4[%c0_13, %c0_14], %14 {strides = array<i32>} : memref<2x5xf32, #tpu.memory_space<vmem>>, vector<2x5xf32>,
    } else {
    }
    %c0 = arith.constant 0 : index
    %c0_1 = arith.constant 0 : index
    %c0_2 = arith.constant 0 : index
    %3 = vector.load %arg1[%c0, %c0_1, %c0_2] : memref<2x16x128xbf16, #tpu.memory_space<vmem>>, vector<2x16x128xbf16>
    %4 = arith.extf %3 : vector<2x16x128xbf16> to vector<2x16x128xf32>
    %cst = arith.constant dense<0.000000e+00> : vector<2x128xf32>
    %5 = vector.multi_reduction <add>, %4, %cst [1] : vector<2x16x128xf32> to vector<2x128xf32>
    %c0_3 = arith.constant 0 : index
    %c0_4 = arith.constant 0 : index
    %6 = vector.load %arg4[%c0_3, %c0_4] : memref<2x5xf32, #tpu.memory_space<vmem>>, vector<2x5xf32>
    %c0_5 = arith.constant 0 : index
    %c0_6 = arith.constant 0 : index
    %7 = vector.load %arg2[%c0_5, %c0_6] : memref<128x5xf32, #tpu.memory_space<vmem>>, vector<128x5xf32>
    %cst_7 = arith.constant dense<0.000000e+00> : vector<2x5xf32>
    %8 = tpu.matmul %5, %7, %cst_7 {dimension_numbers = #tpu.dot_dimension_numbers<[1], [0], [0], [1], [0, 0, 1, 1], [], []>} : vector<2x128xf32>, vector<128x5xf32>, vector<2x5xf32> -> vector<2x5xf32>
    %9 = arith.addf %6, %8 : vector<2x5xf32>
    %c0_8 = arith.constant 0 : index
    %c0_9 = arith.constant 0 : index
    %10 = vector.load %arg4[%c0_8, %c0_9] : memref<2x5xf32, #tpu.memory_space<vmem>>, vector<2x5xf32>
    tpu.vector_store %arg4[%c0_8, %c0_9], %9 {strides = array<i32>} : memref<2x5xf32, #tpu.memory_space<vmem>>, vector<2x5xf32>,
    %c0_i32_10 = arith.constant 0 : i32
    %11 = arith.cmpi eq, %arg0, %c0_i32_10 : i32
    %12 = arith.extui %11 : i1 to i32
    %c0_i32_11 = arith.constant 0 : i32
    %13 = arith.cmpi ne, %12, %c0_i32_11 : i32
    scf.if %13 {
      %c0_12 = arith.constant 0 : index
      %c0_13 = arith.constant 0 : index
      %14 = vector.load %arg4[%c0_12, %c0_13] : memref<2x5xf32, #tpu.memory_space<vmem>>, vector<2x5xf32>
      %cst_14 = arith.constant 6.250000e-02 : f32
      %15 = vector.broadcast %cst_14 : f32 to vector<2x5xf32>
      %16 = arith.mulf %14, %15 : vector<2x5xf32>
      %c0_15 = arith.constant 0 : index
      %c0_16 = arith.constant 0 : index
      %17 = vector.load %arg3[%c0_15, %c0_16] : memref<1x5xf32, #tpu.memory_space<vmem>>, vector<1x5xf32>
      %18 = vector.broadcast %17 : vector<1x5xf32> to vector<2x5xf32>
      %19 = arith.addf %16, %18 : vector<2x5xf32>
      %c0_17 = arith.constant 0 : index
      %c0_18 = arith.constant 0 : index
      %20 = vector.load %arg4[%c0_17, %c0_18] : memref<2x5xf32, #tpu.memory_space<vmem>>, vector<2x5xf32>
      tpu.vector_store %arg4[%c0_17, %c0_18], %19 {strides = array<i32>} : memref<2x5xf32, #tpu.memory_space<vmem>>, vector<2x5xf32>,
    } else {
    }
    return
  }
  func.func @transform_0(%arg0: i32) -> (i32, i32, i32) {
    %c0_i32 = arith.constant 0 : i32
    %c0_i32_0 = arith.constant 0 : i32
    %c0_i32_1 = arith.constant 0 : i32
    return %c0_i32, %arg0, %c0_i32_0 : i32, i32, i32
  }
  func.func @transform_1(%arg0: i32) -> (i32, i32) {
    %c0_i32 = arith.constant 0 : i32
    %c0_i32_0 = arith.constant 0 : i32
    %c0_i32_1 = arith.constant 0 : i32
    return %c0_i32, %c0_i32_0 : i32, i32
  }
  func.func @transform_2(%arg0: i32) -> (i32, i32) {
    %c0_i32 = arith.constant 0 : i32
    %c0_i32_0 = arith.constant 0 : i32
    %c0_i32_1 = arith.constant 0 : i32
    return %c0_i32, %c0_i32_0 : i32, i32
  }
  func.func @transform_3(%arg0: i32) -> (i32, i32) {
    %c0_i32 = arith.constant 0 : i32
    %c0_i32_0 = arith.constant 0 : i32
    %c0_i32_1 = arith.constant 0 : i32
    return %c0_i32, %c0_i32_0 : i32, i32
  }
}

</mosaic_0001>

<bundles_post_ra>
// kernel: resnet_classifier_forward.10
= control target key start
LH: loop header
LB: loop body
LE: loop exit
PB: predicated region body
PF: predicated region fallthrough
CT: control target
= control target key end

     0   :  { %v238_v1 = vmov 0   ;;  %vm67_vm0 = vcmask 261120   ;;  %v27_v7 = vlaneseq  ;;  %s297_s1 = inlined_call_operand.vmem [shape: bf16[32,256], index: 1, kind: input, shape index: {}]   ;;  %s298_s0 = inlined_call_operand.vmem [shape: bf16[32,32], index: 0, kind: input, shape index: {}]   ;;  %s299_s2 = inlined_call_operand.vmem [shape: f32[1,256], index: 2, kind: input, shape index: {}]   ;;  %s300_s4 = inlined_call_operand.vmem [shape: bf16[32,128], index: 4, kind: output, shape index: {1}]   ;;  %s301_s3 = inlined_call_operand.vmem [shape: bf16[32,128], index: 3, kind: output, shape index: {0}]  }
   0x1   :  { %v230_v0 = vld [vmem:[%s297_s1 + $0x4] ss:$8 sps:$4 sm:$0xff]   ;;  %106 = vmatprep.mubr.bf16.mxu0 %v238_v1  ;;  %116 = vmatprep.mubr.bf16.mxu1 %v238_v1  ;;  %v232_v2 = vld [vmem:[%s297_s1] ss:$8 sps:$4 sm:$0xff]   ;;  %v233_v3 = vld [vmem:[%s297_s1 + $0x14] ss:$8 sps:$4 sm:$0xff]  }
   0x2   :  { %74 = vmatprep.subr.bf16.mxu0 %v230_v0  ;;  %225 = vmatprep.subr.bf16.mxu1 %v230_v0  ;;  %v235_v4 = vld [vmem:[%s297_s1 + $0x10] ss:$8 sps:$4 sm:$0xff]   ;;  %v236_v5 = vld [vmem:[%s298_s0] sm:$0xff]   ;;  %v237_v6 = vld [vmem:[%s298_s0 + $0x8] sm:$0xff]   ;;  %v28_v8 = vshrl.u32 %v27_v7, 7 }
   0x3   :  { %75 = vmatpush1.bf16.msra.mxu0 %v232_v2  ;;  %227 = vmatpush1.bf16.msra.mxu1 %v232_v2  ;;  %v25_v10 = vld [vmem:[%s299_s2] sm:$0x3] }
   0x4   :  { %76 = vmatprep.subr.bf16.mxu0 %v233_v3  ;;  %226 = vmatprep.subr.bf16.mxu1 %v233_v3  ;;  %v29_v9 = vsub.s32 0, %v28_v8  ;;  %v33_v11 = vsub.s32 1, %v28_v8 }
   0x6   :  { %v30_v12 = vrot.slane %v25_v10, %v29_v9  ;;  %v34_v15 = vrot.slane %v25_v10, %v33_v11 }
   0x7   :  { %77 = vmatpush1.bf16.msra.mxu0 %v235_v4  ;;  %228 = vmatpush1.bf16.msra.mxu1 %v235_v4 }
   0xa   :  { %185 = vmatmul.mubr.msk.bf16.vlgmr.msra.gmra.mrb[0].mxu0 %vm67_vm0, %v236_v5  ;;  %186 = vmatmul.mubr.msk.bf16.vlgmr.msra.gmra.mrb[0].mxu1 %vm67_vm0, %v237_v6 }
  0xdd   :  { %v108_v13 = vpop.f32.mrb[0].mxu0  ;;  %v118_v14 = vpop.f32.mrb[0].mxu1 }
  0xde   :  { %v109_v16 = vadd.f32 %v108_v13, %v30_v12  ;;  %v119_v17 = vadd.f32 %v118_v14, %v30_v12  ;;  %v110_v18 = vpop.f32.mrb[1].mxu0  ;;  %v120_v19 = vpop.f32.mrb[1].mxu1 }
  0xdf   :  { %v112_v20 = vpop.f32.mrb[2].mxu0  ;;  %v122_v21 = vpop.f32.mrb[2].mxu1  ;;  %v111_v26 = vadd.f32 %v110_v18, %v34_v15  ;;  %v121_v27 = vadd.f32 %v120_v19, %v34_v15 }
  0xe0   :  { %v113_v22 = vadd.f32 %v112_v20, %v30_v12  ;;  %v123_v23 = vadd.f32 %v122_v21, %v30_v12  ;;  %v114_v24 = vpop.f32.mrb[3].mxu0  ;;  %v124_v25 = vpop.f32.mrb[3].mxu1  ;;  %v127_v30 = vmax.f32 %v109_v16, 0.0  ;;  %v129_v31 = vmax.f32 %v119_v17, 0.0 }
  0xe1   :  { %v115_v28 = vadd.f32 %v114_v24, %v34_v15  ;;  %v125_v29 = vadd.f32 %v124_v25, %v34_v15 }
  0xe2   :  { %v128_v32 = vmax.f32 %v113_v22, 0.0  ;;  %v130_v33 = vmax.f32 %v123_v23, 0.0 }
  0xe3   :  { %v216_v34 = vpack.c.bf16 %v115_v28, %v111_v26  ;;  %v221_v35 = vpack.c.bf16 %v125_v29, %v121_v27 }
  0xe4   :  { %v206_v36 = vpack.c.bf16 %v128_v32, %v127_v30  ;;  %v211_v37 = vpack.c.bf16 %v130_v33, %v129_v31 }
  0xe5   :  { %217 = vst [vmem:[%s300_s4] sm:$0xff] %v216_v34   ;;  %224 = vst [vmem:[%s300_s4 + $0x8] sm:$0xff] %v221_v35  }
  0xe6   :  { %207 = vst [vmem:[%s301_s3] sm:$0xff] %v206_v36   ;;  %223 = vst [vmem:[%s301_s3 + $0x8] sm:$0xff] %v211_v37  }

// kernel: resnet_classifier_forward.11
= control target key start
LH: loop header
LB: loop body
LE: loop exit
PB: predicated region body
PF: predicated region fallthrough
CT: control target
= control target key end

     0   :  { %s970_s1 = inlined_call_operand.vmem [shape: bf16[640,128], index: 1, kind: input, shape index: {}]   ;;  %s971_s0 = inlined_call_operand.vmem [shape: bf16[32,640], index: 0, kind: input, shape index: {}]   ;;  %s972_s2 = inlined_call_operand.vmem [shape: f32[1,128], index: 2, kind: input, shape index: {}]   ;;  %s973_s3 = inlined_call_operand.vmem [shape: bf16[32,128], index: 3, kind: output, shape index: {}]  }
   0x1   :  { %v737_v0 = vld [vmem:[%s970_s1 + $0x40] sm:$0xff]   ;;  %v741_v4 = vld [vmem:[%s970_s1 + $0x48] sm:$0xff]   ;;  %v745_v8 = vld [vmem:[%s970_s1 + $0x50] sm:$0xff]  }
   0x2   :  { %v738_v1 = vld [vmem:[%s970_s1] sm:$0xff]   ;;  %651 = vmatprep.subr.bf16.mxu0 %v737_v0  ;;  %v742_v5 = vld [vmem:[%s970_s1 + $0x8] sm:$0xff]   ;;  %v746_v9 = vld [vmem:[%s970_s1 + $0x10] sm:$0xff]  }
   0x3   :  { %v739_v2 = vld [vmem:[%s970_s1 + $0xc0] sm:$0xff]   ;;  %652 = vmatpush3.bf16.msra.mxu0 %v738_v1  ;;  %v743_v6 = vld [vmem:[%s970_s1 + $0xc8] sm:$0xff]   ;;  %v747_v10 = vld [vmem:[%s970_s1 + $0xd0] sm:$0xff]  }
   0x4   :  { %v740_v3 = vld [vmem:[%s970_s1 + $0x80] sm:$0xff]   ;;  %679 = vmatprep.subr.bf16.mxu1 %v739_v2  ;;  %653 = vmatprep.subr.bf16.mxu0 %v741_v4  ;;  %v744_v7 = vld [vmem:[%s970_s1 + $0x88] sm:$0xff]   ;;  %v748_v11 = vld [vmem:[%s970_s1 + $0x90] sm:$0xff]  }
   0x5   :  { %680 = vmatpush3.bf16.msra.mxu1 %v740_v3  ;;  %v749_v12 = vld [vmem:[%s970_s1 + $0x58] sm:$0xff]   ;;  %v753_v16 = vld [vmem:[%s970_s1 + $0x60] sm:$0xff]   ;;  %v757_v20 = vld [vmem:[%s970_s1 + $0x68] sm:$0xff]  }
   0x6   :  { %681 = vmatprep.subr.bf16.mxu1 %v743_v6  ;;  %v750_v13 = vld [vmem:[%s970_s1 + $0x18] sm:$0xff]   ;;  %v754_v17 = vld [vmem:[%s970_s1 + $0x20] sm:$0xff]   ;;  %v758_v21 = vld [vmem:[%s970_s1 + $0x28] sm:$0xff]  }
   0x7   :  { %654 = vmatpush3.bf16.msra.mxu0 %v742_v5  ;;  %v751_v14 = vld [vmem:[%s970_s1 + $0xd8] sm:$0xff]   ;;  %v755_v18 = vld [vmem:[%s970_s1 + $0xe0] sm:$0xff]   ;;  %v759_v22 = vld [vmem:[%s970_s1 + $0xe8] sm:$0xff]  }
   0x8   :  { %655 = vmatprep.subr.bf16.mxu0 %v745_v8  ;;  %v752_v15 = vld [vmem:[%s970_s1 + $0x98] sm:$0xff]   ;;  %v756_v19 = vld [vmem:[%s970_s1 + $0xa0] sm:$0xff]   ;;  %v760_v23 = vld [vmem:[%s970_s1 + $0xa8] sm:$0xff]  }
   0x9   :  { %682 = vmatpush3.bf16.msra.mxu1 %v744_v7  ;;  %v761_v24 = vld [vmem:[%s970_s1 + $0x70] sm:$0xff]   ;;  %v765_v28 = vld [vmem:[%s970_s1 + $0x78] sm:$0xff]   ;;  %v772_v34 = vld [vmem:[%s970_s1 + $0x100] sm:$0xff]  }
   0xa   :  { %683 = vmatprep.subr.bf16.mxu1 %v747_v10  ;;  %v762_v25 = vld [vmem:[%s970_s1 + $0x30] sm:$0xff]   ;;  %v766_v29 = vld [vmem:[%s970_s1 + $0x38] sm:$0xff]   ;;  %v775_v36 = vld [vmem:[%s971_s0 + $0xc] ss:$20 sps:$4 sm:$0xff]  }
   0xb   :  { %656 = vmatpush3.bf16.msra.mxu0 %v746_v9  ;;  %v763_v26 = vld [vmem:[%s970_s1 + $0xf0] sm:$0xff]   ;;  %v767_v30 = vld [vmem:[%s970_s1 + $0xf8] sm:$0xff]   ;;  %v776_v37 = vld [vmem:[%s970_s1 + $0x108] sm:$0xff]   ;;  %487 = vmatprep.mubr.bf16.mxu1 %v775_v36 }
   0xc   :  { %657 = vmatprep.subr.bf16.mxu0 %v749_v12  ;;  %v764_v27 = vld [vmem:[%s970_s1 + $0xb0] sm:$0xff]   ;;  %v770_v32 = vld [vmem:[%s971_s0 + $0x4] ss:$20 sps:$4 sm:$0xff]   ;;  %v773_v35 = vld [vmem:[%s971_s0 + $0x8] ss:$20 sps:$4 sm:$0xff]  }
   0xd   :  { %684 = vmatpush3.bf16.msra.mxu1 %v748_v11  ;;  %v768_v31 = vld [vmem:[%s971_s0] ss:$20 sps:$4 sm:$0xff]   ;;  %v771_v33 = vld [vmem:[%s970_s1 + $0xb8] sm:$0xff]   ;;  %438 = vmatprep.mubr.bf16.mxu0 %v770_v32  ;;  %v786_v43 = vld [vmem:[%s971_s0 + $0x30] ss:$20 sps:$4 sm:$0xff]  }
   0xe   :  { %685 = vmatprep.subr.bf16.mxu1 %v751_v14  ;;  %v777_v38 = vld [vmem:[%s970_s1 + $0x110] sm:$0xff]   ;;  %v780_v39 = vld [vmem:[%s971_s0 + $0x2c] ss:$20 sps:$4 sm:$0xff]   ;;  %v778_v40 = vld [vmem:[%s970_s1 + $0x118] sm:$0xff]  }
   0xf   :  { %658 = vmatpush3.bf16.msra.mxu0 %v750_v13  ;;  %v783_v41 = vld [vmem:[%s971_s0 + $0x28] ss:$20 sps:$4 sm:$0xff]   ;;  %v779_v44 = vld [vmem:[%s970_s1 + $0x120] sm:$0xff]   ;;  %v787_v47 = vld [vmem:[%s970_s1 + $0x130] sm:$0xff]  }
  0x10   :  { %659 = vmatprep.subr.bf16.mxu0 %v753_v16  ;;  %v784_v42 = vld [vmem:[%s971_s0 + $0x34] ss:$20 sps:$4 sm:$0xff]   ;;  %v789_v45 = vld [vmem:[%s971_s0 + $0x10] ss:$20 sps:$4 sm:$0xff]   ;;  %v788_v48 = vld [vmem:[%s970_s1 + $0x138] sm:$0xff]  }
  0x11   :  { %686 = vmatpush3.bf16.msra.mxu1 %v752_v15  ;;  %v782_v46 = vld [vmem:[%s970_s1 + $0x128] sm:$0xff]   ;;  %v581_v51 = vld [vmem:[%s972_s2] ss:$0 sm:$0xff] }
  0x12   :  { %687 = vmatprep.subr.bf16.mxu1 %v755_v18  ;;  %v790_v49 = vld [vmem:[%s971_s0 + $0x38] ss:$20 sps:$4 sm:$0xff]  }
  0x13   :  { %660 = vmatpush3.bf16.msra.mxu0 %v754_v17 }
  0x14   :  { %661 = vmatprep.subr.bf16.mxu0 %v757_v20 }
  0x15   :  { %688 = vmatpush3.bf16.msra.mxu1 %v756_v19 }
  0x16   :  { %689 = vmatprep.subr.bf16.mxu1 %v759_v22 }
  0x17   :  { %662 = vmatpush3.bf16.msra.mxu0 %v758_v21 }
  0x18   :  { %663 = vmatprep.subr.bf16.mxu0 %v761_v24 }
  0x19   :  { %690 = vmatpush3.bf16.msra.mxu1 %v760_v23 }
  0x1a   :  { %691 = vmatprep.subr.bf16.mxu1 %v763_v26 }
  0x1b   :  { %664 = vmatpush3.bf16.msra.mxu0 %v762_v25 }
  0x1c   :  { %665 = vmatprep.subr.bf16.mxu0 %v765_v28 }
  0x1d   :  { %692 = vmatpush3.bf16.msra.mxu1 %v764_v27 }
  0x1e   :  { %693 = vmatprep.subr.bf16.mxu1 %v767_v30 }
  0x1f   :  { %666 = vmatpush3.bf16.msra.mxu0 %v766_v29 }
  0x20   :  { %717 = vmatprep.subr.bf16.mxu0 %v772_v34 }
  0x21   :  { %694 = vmatpush3.bf16.msra.mxu1 %v771_v33 }
  0x22   :  { %439 = vmatmul.mubr.bf16.vlgmr.msra.gmra.mrb[0].mxu0 %v768_v31 }
  0x23   :  { %718 = vmatpush3.bf16.msra.mxu0 %v772_v34  ;;  %446 = vmatprep.mubr.bf16.mxu0 %v780_v39 }
  0x24   :  { %488 = vmatmul.mubr.bf16.vlgmr.msra.gmra.mrb[0].mxu1 %v773_v35  ;;  %719 = vmatprep.subr.bf16.mxu0 %v776_v37 }
  0x25   :  { %495 = vmatprep.mubr.bf16.mxu1 %v784_v42 }
  0x27   :  { %720 = vmatpush3.bf16.msra.mxu0 %v776_v37 }
  0x28   :  { %721 = vmatprep.subr.bf16.mxu0 %v777_v38 }
  0x2a   :  { %447 = vmatmul.mubr.bf16.gmra.mrb[4].mxu0 %v783_v41 }
  0x2b   :  { %722 = vmatpush3.bf16.msra.mxu0 %v777_v38  ;;  %733 = vmatprep.mubr.bf16.mxu0 %v789_v45 }
  0x2c   :  { %723 = vmatprep.subr.bf16.mxu0 %v778_v40  ;;  %496 = vmatmul.mubr.bf16.gmra.mrb[4].mxu1 %v786_v43 }
  0x2f   :  { %724 = vmatpush3.bf16.msra.mxu0 %v778_v40 }
  0x30   :  { %725 = vmatprep.subr.bf16.mxu0 %v779_v44 }
  0x33   :  { %726 = vmatpush3.bf16.msra.mxu0 %v779_v44 }
  0x34   :  { %727 = vmatprep.subr.bf16.mxu0 %v782_v46 }
  0x37   :  { %728 = vmatpush3.bf16.msra.mxu0 %v782_v46 }
  0x38   :  { %729 = vmatprep.subr.bf16.mxu0 %v787_v47 }
  0x3b   :  { %730 = vmatpush3.bf16.msra.mxu0 %v787_v47 }
  0x3c   :  { %731 = vmatprep.subr.bf16.mxu0 %v788_v48 }
  0x3f   :  { %732 = vmatpush3.bf16.msra.mxu0 %v788_v48 }
  0x42   :  { %734 = vmatmul.mubr.bf16.vlgmr.msra.gmra.mrb[8].mxu0 %v790_v49 }
  0xf5   :  { %v667_v50 = vpop.f32.mrb[0].mxu0 }
  0xf6   :  { %v668_v52 = vpop.f32.mrb[1].mxu0 }
  0xf7   :  { %v669_v53 = vadd.f32 %v668_v52, %v667_v50  ;;  %v670_v54 = vpop.f32.mrb[2].mxu0  ;;  %v695_v55 = vpop.f32.mrb[0].mxu1 }
  0xf8   :  { %v671_v56 = vpop.f32.mrb[3].mxu0  ;;  %v696_v59 = vpop.f32.mrb[1].mxu1 }
  0xf9   :  { %v441_v57 = vadd.f32 %v669_v53, %v581_v51  ;;  %v672_v58 = vadd.f32 %v671_v56, %v670_v54  ;;  %v697_v60 = vadd.f32 %v696_v59, %v695_v55  ;;  %v698_v61 = vpop.f32.mrb[2].mxu1 }
  0xfa   :  { %v699_v63 = vpop.f32.mrb[3].mxu1 }
  0xfb   :  { %v444_v62 = vadd.f32 %v672_v58, %v581_v51  ;;  %v700_v0 = vadd.f32 %v699_v63, %v698_v61  ;;  %v490_v1 = vadd.f32 %v697_v60, %v441_v57 }
  0xfd   :  { %v673_v2 = vpop.f32.mrb[4].mxu0  ;;  %v493_v4 = vadd.f32 %v700_v0, %v444_v62 }
  0xfe   :  { %v674_v3 = vpop.f32.mrb[5].mxu0 }
  0xff   :  { %v675_v5 = vadd.f32 %v674_v3, %v673_v2  ;;  %v676_v6 = vpop.f32.mrb[6].mxu0  ;;  %v701_v7 = vpop.f32.mrb[4].mxu1 }
 0x100   :  { %v677_v8 = vpop.f32.mrb[7].mxu0  ;;  %v702_v11 = vpop.f32.mrb[5].mxu1 }
 0x101   :  { %v449_v9 = vadd.f32 %v675_v5, %v581_v51  ;;  %v678_v10 = vadd.f32 %v677_v8, %v676_v6  ;;  %v703_v12 = vadd.f32 %v702_v11, %v701_v7  ;;  %v704_v13 = vpop.f32.mrb[6].mxu1 }
 0x102   :  { %v705_v15 = vpop.f32.mrb[7].mxu1 }
 0x103   :  { %v452_v14 = vadd.f32 %v678_v10, %v581_v51  ;;  %v706_v16 = vadd.f32 %v705_v15, %v704_v13  ;;  %v498_v17 = vadd.f32 %v703_v12, %v449_v9 }
 0x105   :  { %v501_v18 = vadd.f32 %v706_v16, %v452_v14 }
 0x115   :  { %v735_v19 = vpop.f32.mrb[8].mxu0 }
 0x116   :  { %v547_v20 = vadd.f32 %v735_v19, %v498_v17  ;;  %v538_v21 = vpop.f32.mrb[9].mxu0 }
 0x117   :  { %v539_v22 = vadd.f32 %v538_v21, %v490_v1  ;;  %v736_v23 = vpop.f32.mrb[10].mxu0 }
 0x118   :  { %v550_v24 = vadd.f32 %v736_v23, %v501_v18  ;;  %v541_v25 = vpop.f32.mrb[11].mxu0  ;;  %v555_v27 = vmax.f32 %v547_v20, 0.0 }
 0x119   :  { %v542_v26 = vadd.f32 %v541_v25, %v493_v4  ;;  %v553_v29 = vmax.f32 %v539_v22, 0.0 }
 0x11a   :  { %v556_v28 = vmax.f32 %v550_v24, 0.0 }
 0x11b   :  { %v554_v30 = vmax.f32 %v542_v26, 0.0 }
 0x11c   :  { %v648_v31 = vpack.c.bf16 %v556_v28, %v555_v27 }
 0x11d   :  { %v643_v32 = vpack.c.bf16 %v554_v30, %v553_v29 }
 0x11e   :  { %650 = vst [vmem:[%s973_s3 + $0x8] sm:$0xff] %v648_v31  }
 0x11f   :  { %644 = vst [vmem:[%s973_s3] sm:$0xff] %v643_v32  }

// kernel: resnet_classifier_forward.12
= control target key start
LH: loop header
LB: loop body
LE: loop exit
PB: predicated region body
PF: predicated region fallthrough
CT: control target
= control target key end

     0   :  { %s1434_s1 = inlined_call_operand.vmem [shape: bf16[1024,128], index: 1, kind: input, shape index: {}]   ;;  %s1435_s0 = inlined_call_operand.vmem [shape: bf16[32,1024], index: 0, kind: input, shape index: {}]   ;;  %s1436_s2 = inlined_call_operand.vmem [shape: f32[1,128], index: 2, kind: input, shape index: {}]   ;;  %s1437_s3 = inlined_call_operand.vmem [shape: bf16[32,128], index: 3, kind: input, shape index: {}]   ;;  %s1438_s4 = inlined_call_operand.vmem [shape: bf16[32,128], index: 4, kind: output, shape index: {}]  }
   0x1   :  { %v1090_v0 = vld [vmem:[%s1434_s1 + $0x40] sm:$0xff]   ;;  %v1094_v4 = vld [vmem:[%s1434_s1 + $0x48] sm:$0xff]   ;;  %v1098_v8 = vld [vmem:[%s1434_s1 + $0x50] sm:$0xff]  }
   0x2   :  { %v1091_v1 = vld [vmem:[%s1434_s1 + $0xc0] sm:$0xff]   ;;  %978 = vmatprep.subr.bf16.mxu0 %v1090_v0  ;;  %v1095_v5 = vld [vmem:[%s1434_s1 + $0xc8] sm:$0xff]   ;;  %v1099_v9 = vld [vmem:[%s1434_s1 + $0xd0] sm:$0xff]  }
   0x3   :  { %v1092_v2 = vld [vmem:[%s1434_s1] sm:$0xff]   ;;  %1006 = vmatprep.subr.bf16.mxu1 %v1091_v1  ;;  %v1096_v6 = vld [vmem:[%s1434_s1 + $0x8] sm:$0xff]   ;;  %v1100_v10 = vld [vmem:[%s1434_s1 + $0x10] sm:$0xff]  }
   0x4   :  { %v1093_v3 = vld [vmem:[%s1434_s1 + $0x80] sm:$0xff]   ;;  %979 = vmatpush3.bf16.msra.mxu0 %v1092_v2  ;;  %v1097_v7 = vld [vmem:[%s1434_s1 + $0x88] sm:$0xff]   ;;  %v1101_v11 = vld [vmem:[%s1434_s1 + $0x90] sm:$0xff]  }
   0x5   :  { %1007 = vmatpush3.bf16.msra.mxu1 %v1093_v3  ;;  %980 = vmatprep.subr.bf16.mxu0 %v1094_v4  ;;  %v1102_v12 = vld [vmem:[%s1434_s1 + $0x58] sm:$0xff]   ;;  %v1106_v16 = vld [vmem:[%s1434_s1 + $0x60] sm:$0xff]   ;;  %v1110_v20 = vld [vmem:[%s1434_s1 + $0x68] sm:$0xff]  }
   0x6   :  { %1008 = vmatprep.subr.bf16.mxu1 %v1095_v5  ;;  %v1103_v13 = vld [vmem:[%s1434_s1 + $0xd8] sm:$0xff]   ;;  %v1107_v17 = vld [vmem:[%s1434_s1 + $0xe0] sm:$0xff]   ;;  %v1111_v21 = vld [vmem:[%s1434_s1 + $0xe8] sm:$0xff]  }
   0x7   :  { %v1104_v14 = vld [vmem:[%s1434_s1 + $0x18] sm:$0xff]   ;;  %v1108_v18 = vld [vmem:[%s1434_s1 + $0x20] sm:$0xff]   ;;  %v1112_v22 = vld [vmem:[%s1434_s1 + $0x28] sm:$0xff]  }
   0x8   :  { %981 = vmatpush3.bf16.msra.mxu0 %v1096_v6  ;;  %v1105_v15 = vld [vmem:[%s1434_s1 + $0x98] sm:$0xff]   ;;  %v1109_v19 = vld [vmem:[%s1434_s1 + $0xa0] sm:$0xff]   ;;  %v1113_v23 = vld [vmem:[%s1434_s1 + $0xa8] sm:$0xff]  }
   0x9   :  { %1009 = vmatpush3.bf16.msra.mxu1 %v1097_v7  ;;  %982 = vmatprep.subr.bf16.mxu0 %v1098_v8  ;;  %v1114_v24 = vld [vmem:[%s1434_s1 + $0x70] sm:$0xff]   ;;  %v1118_v28 = vld [vmem:[%s1434_s1 + $0x78] sm:$0xff]   ;;  %v18_v32 = vld [vmem:[%s1435_s0] sm:$0xff] }
   0xa   :  { %1010 = vmatprep.subr.bf16.mxu1 %v1099_v9  ;;  %v1115_v25 = vld [vmem:[%s1434_s1 + $0xf0] sm:$0xff]   ;;  %v1119_v29 = vld [vmem:[%s1434_s1 + $0xf8] sm:$0xff]   ;;  %v22_v33 = vld [vmem:[%s1435_s0 + $0x20] sm:$0xff] }
   0xb   :  { %v1116_v26 = vld [vmem:[%s1434_s1 + $0x30] sm:$0xff]   ;;  %v1120_v30 = vld [vmem:[%s1434_s1 + $0x38] sm:$0xff]   ;;  %v19_v34 = vld [vmem:[%s1435_s0 + $0x8] sm:$0xff]  ;;  %v870_v35 = vcombine.low %v18_v32, %v22_v33  ;;  %v871_v36 = vcombine.high %v18_v32, %v22_v33 }
   0xc   :  { %983 = vmatpush3.bf16.msra.mxu0 %v1100_v10  ;;  %v1117_v27 = vld [vmem:[%s1434_s1 + $0xb0] sm:$0xff]   ;;  %v1121_v31 = vld [vmem:[%s1434_s1 + $0xb8] sm:$0xff]   ;;  %v23_v37 = vld [vmem:[%s1435_s0 + $0x28] sm:$0xff] }
   0xd   :  { %1011 = vmatpush3.bf16.msra.mxu1 %v1101_v11  ;;  %984 = vmatprep.subr.bf16.mxu0 %v1102_v12  ;;  %v872_v38 = vcombine.low %v19_v34, %v23_v37  ;;  %v873_v39 = vcombine.high %v19_v34, %v23_v37  ;;  %v1122_v40 = vld [vmem:[%s1434_s1 + $0x140] sm:$0xff]   ;;  %v1126_v44 = vld [vmem:[%s1434_s1 + $0x148] sm:$0xff]   ;;  %v1130_v48 = vld [vmem:[%s1434_s1 + $0x150] sm:$0xff]  }
   0xe   :  { %1012 = vmatprep.subr.bf16.mxu1 %v1103_v13  ;;  %665 = vmatprep.mubr.bf16.mxu0 %v871_v36  ;;  %v1123_v41 = vld [vmem:[%s1434_s1 + $0x1c0] sm:$0xff]   ;;  %v1127_v45 = vld [vmem:[%s1434_s1 + $0x1c8] sm:$0xff]   ;;  %v1131_v49 = vld [vmem:[%s1434_s1 + $0x1d0] sm:$0xff]  }
   0xf   :  { %714 = vmatprep.mubr.bf16.mxu1 %v873_v39  ;;  %v1124_v42 = vld [vmem:[%s1434_s1 + $0x100] sm:$0xff]   ;;  %v1128_v46 = vld [vmem:[%s1434_s1 + $0x108] sm:$0xff]   ;;  %v1132_v50 = vld [vmem:[%s1434_s1 + $0x110] sm:$0xff]  }
  0x10   :  { %985 = vmatpush3.bf16.msra.mxu0 %v1104_v14  ;;  %v1125_v43 = vld [vmem:[%s1434_s1 + $0x180] sm:$0xff]   ;;  %v1129_v47 = vld [vmem:[%s1434_s1 + $0x188] sm:$0xff]   ;;  %v1133_v51 = vld [vmem:[%s1434_s1 + $0x190] sm:$0xff]  }
  0x11   :  { %1013 = vmatpush3.bf16.msra.mxu1 %v1105_v15  ;;  %986 = vmatprep.subr.bf16.mxu0 %v1106_v16  ;;  %v1134_v52 = vld [vmem:[%s1434_s1 + $0x158] sm:$0xff]   ;;  %v1138_v56 = vld [vmem:[%s1434_s1 + $0x160] sm:$0xff]   ;;  %v1142_v63 = vld [vmem:[%s1434_s1 + $0x168] sm:$0xff]  }
  0x12   :  { %1014 = vmatprep.subr.bf16.mxu1 %v1107_v17  ;;  %v1135_v53 = vld [vmem:[%s1434_s1 + $0x1d8] sm:$0xff]   ;;  %v1139_v57 = vld [vmem:[%s1434_s1 + $0x1e0] sm:$0xff]   ;;  %v1143_v1 = vld [vmem:[%s1434_s1 + $0x1e8] sm:$0xff]  }
  0x13   :  { %v1136_v54 = vld [vmem:[%s1434_s1 + $0x118] sm:$0xff]   ;;  %v1140_v58 = vld [vmem:[%s1434_s1 + $0x120] sm:$0xff]   ;;  %v1144_v2 = vld [vmem:[%s1434_s1 + $0x128] sm:$0xff]  }
  0x14   :  { %987 = vmatpush3.bf16.msra.mxu0 %v1108_v18  ;;  %v1137_v55 = vld [vmem:[%s1434_s1 + $0x198] sm:$0xff]   ;;  %v1141_v59 = vld [vmem:[%s1434_s1 + $0x1a0] sm:$0xff]   ;;  %v1145_v3 = vld [vmem:[%s1434_s1 + $0x1a8] sm:$0xff]  }
  0x15   :  { %1015 = vmatpush3.bf16.msra.mxu1 %v1109_v19  ;;  %988 = vmatprep.subr.bf16.mxu0 %v1110_v20  ;;  %v26_v60 = vld [vmem:[%s1435_s0 + $0x40] sm:$0xff]  ;;  %v27_v4 = vld [vmem:[%s1435_s0 + $0x48] sm:$0xff]  ;;  %v1146_v8 = vld [vmem:[%s1434_s1 + $0x170] sm:$0xff]  }
  0x16   :  { %1016 = vmatprep.subr.bf16.mxu1 %v1111_v21  ;;  %v30_v61 = vld [vmem:[%s1435_s0 + $0x60] sm:$0xff]  ;;  %v31_v5 = vld [vmem:[%s1435_s0 + $0x68] sm:$0xff]  ;;  %v1147_v9 = vld [vmem:[%s1434_s1 + $0x1f0] sm:$0xff]  }
  0x17   :  { %v879_v62 = vcombine.high %v26_v60, %v30_v61  ;;  %v878_v0 = vcombine.low %v26_v60, %v30_v61  ;;  %v881_v6 = vcombine.high %v27_v4, %v31_v5  ;;  %v880_v7 = vcombine.low %v27_v4, %v31_v5  ;;  %v1148_v10 = vld [vmem:[%s1434_s1 + $0x130] sm:$0xff]   ;;  %v1150_v12 = vld [vmem:[%s1434_s1 + $0x178] sm:$0xff]   ;;  %v869_v34 = vld [vmem:[%s1436_s2] ss:$0 sm:$0xff] }
  0x18   :  { %989 = vmatpush3.bf16.msra.mxu0 %v1112_v22  ;;  %v1149_v11 = vld [vmem:[%s1434_s1 + $0x1b0] sm:$0xff]   ;;  %v1151_v13 = vld [vmem:[%s1434_s1 + $0x1f8] sm:$0xff]   ;;  %v959_v5 = vld [vmem:[%s1437_s3] sm:$0xff]  }
  0x19   :  { %1017 = vmatpush3.bf16.msra.mxu1 %v1113_v23  ;;  %990 = vmatprep.subr.bf16.mxu0 %v1114_v24  ;;  %v1152_v14 = vld [vmem:[%s1434_s1 + $0x138] sm:$0xff]   ;;  %v20_v16 = vld [vmem:[%s1435_s0 + $0x10] sm:$0xff] }
  0x1a   :  { %1018 = vmatprep.subr.bf16.mxu1 %v1115_v25  ;;  %v1153_v15 = vld [vmem:[%s1434_s1 + $0x1b8] sm:$0xff]   ;;  %v24_v17 = vld [vmem:[%s1435_s0 + $0x30] sm:$0xff] }
  0x1b   :  { %v21_v18 = vld [vmem:[%s1435_s0 + $0x18] sm:$0xff]  ;;  %v874_v20 = vcombine.low %v20_v16, %v24_v17  ;;  %v875_v21 = vcombine.high %v20_v16, %v24_v17  ;;  %v28_v24 = vld [vmem:[%s1435_s0 + $0x50] sm:$0xff] }
  0x1c   :  { %991 = vmatpush3.bf16.msra.mxu0 %v1116_v26  ;;  %v25_v19 = vld [vmem:[%s1435_s0 + $0x38] sm:$0xff]  ;;  %v32_v25 = vld [vmem:[%s1435_s0 + $0x70] sm:$0xff] }
  0x1d   :  { %1019 = vmatpush3.bf16.msra.mxu1 %v1117_v27  ;;  %992 = vmatprep.subr.bf16.mxu0 %v1118_v28  ;;  %v876_v22 = vcombine.low %v21_v18, %v25_v19  ;;  %v877_v23 = vcombine.high %v21_v18, %v25_v19  ;;  %v29_v26 = vld [vmem:[%s1435_s0 + $0x58] sm:$0xff]  ;;  %v883_v27 = vcombine.high %v28_v24, %v32_v25  ;;  %v961_v18 = vunpack.c.h.bf16 %v959_v5 }
  0x1e   :  { %1020 = vmatprep.subr.bf16.mxu1 %v1119_v29  ;;  %v33_v28 = vld [vmem:[%s1435_s0 + $0x78] sm:$0xff] }
  0x1f   :  { %v885_v29 = vcombine.high %v29_v26, %v33_v28 }
  0x20   :  { %993 = vmatpush3.bf16.msra.mxu0 %v1120_v30  ;;  %v882_v30 = vcombine.low %v28_v24, %v32_v25 }
  0x21   :  { %1021 = vmatpush3.bf16.msra.mxu1 %v1121_v31  ;;  %1034 = vmatprep.subr.bf16.mxu0 %v1122_v40  ;;  %v884_v31 = vcombine.low %v29_v26, %v33_v28 }
  0x22   :  { %1062 = vmatprep.subr.bf16.mxu1 %v1123_v41 }
  0x23   :  { %666 = vmatmul.mubr.bf16.vlgmr.msra.gmra.mrb[0].mxu0 %v870_v35 }
  0x24   :  { %715 = vmatmul.mubr.bf16.vlgmr.msra.gmra.mrb[0].mxu1 %v872_v38  ;;  %1035 = vmatpush3.bf16.msra.mxu0 %v1124_v42 }
  0x25   :  { %1063 = vmatpush3.bf16.msra.mxu1 %v1125_v43  ;;  %1036 = vmatprep.subr.bf16.mxu0 %v1126_v44 }
  0x26   :  { %1064 = vmatprep.subr.bf16.mxu1 %v1127_v45  ;;  %673 = vmatprep.mubr.bf16.mxu0 %v879_v62 }
  0x27   :  { %722 = vmatprep.mubr.bf16.mxu1 %v881_v6 }
  0x28   :  { %1037 = vmatpush3.bf16.msra.mxu0 %v1128_v46 }
  0x29   :  { %1065 = vmatpush3.bf16.msra.mxu1 %v1129_v47  ;;  %1038 = vmatprep.subr.bf16.mxu0 %v1130_v48 }
  0x2a   :  { %1066 = vmatprep.subr.bf16.mxu1 %v1131_v49 }
  0x2b   :  { %674 = vmatmul.mubr.bf16.gmra.mrb[4].mxu0 %v878_v0 }
  0x2c   :  { %1039 = vmatpush3.bf16.msra.mxu0 %v1132_v50  ;;  %723 = vmatmul.mubr.bf16.gmra.mrb[4].mxu1 %v880_v7 }
  0x2d   :  { %1067 = vmatpush3.bf16.msra.mxu1 %v1133_v51  ;;  %1040 = vmatprep.subr.bf16.mxu0 %v1134_v52 }
  0x2e   :  { %1068 = vmatprep.subr.bf16.mxu1 %v1135_v53  ;;  %763 = vmatprep.mubr.bf16.mxu0 %v875_v21 }
  0x2f   :  { %812 = vmatprep.mubr.bf16.mxu1 %v877_v23  ;;  %v976_v23 = vld [vmem:[%s1437_s3 + $0x8] sm:$0xff]  }
  0x30   :  { %1041 = vmatpush3.bf16.msra.mxu0 %v1136_v54 }
  0x31   :  { %1069 = vmatpush3.bf16.msra.mxu1 %v1137_v55  ;;  %1042 = vmatprep.subr.bf16.mxu0 %v1138_v56 }
  0x32   :  { %1070 = vmatprep.subr.bf16.mxu1 %v1139_v57 }
  0x34   :  { %1043 = vmatpush3.bf16.msra.mxu0 %v1140_v58 }
  0x35   :  { %1071 = vmatpush3.bf16.msra.mxu1 %v1141_v59  ;;  %1044 = vmatprep.subr.bf16.mxu0 %v1142_v63 }
  0x36   :  { %1072 = vmatprep.subr.bf16.mxu1 %v1143_v1 }
  0x38   :  { %1045 = vmatpush3.bf16.msra.mxu0 %v1144_v2 }
  0x39   :  { %1073 = vmatpush3.bf16.msra.mxu1 %v1145_v3  ;;  %1046 = vmatprep.subr.bf16.mxu0 %v1146_v8 }
  0x3a   :  { %1074 = vmatprep.subr.bf16.mxu1 %v1147_v9 }
  0x3c   :  { %1047 = vmatpush3.bf16.msra.mxu0 %v1148_v10 }
  0x3d   :  { %1075 = vmatpush3.bf16.msra.mxu1 %v1149_v11  ;;  %1048 = vmatprep.subr.bf16.mxu0 %v1150_v12 }
  0x3e   :  { %1076 = vmatprep.subr.bf16.mxu1 %v1151_v13  ;;  %v960_v13 = vunpack.c.l.bf16 %v959_v5 }
  0x40   :  { %1049 = vmatpush3.bf16.msra.mxu0 %v1152_v14 }
  0x41   :  { %1077 = vmatpush3.bf16.msra.mxu1 %v1153_v15 }
  0x43   :  { %764 = vmatmul.mubr.bf16.vlgmr.msra.gmra.mrb[8].mxu0 %v874_v20 }
  0x44   :  { %813 = vmatmul.mubr.bf16.vlgmr.msra.gmra.mrb[8].mxu1 %v876_v22  ;;  %771 = vmatprep.mubr.bf16.mxu0 %v883_v27 }
  0x45   :  { %820 = vmatprep.mubr.bf16.mxu1 %v885_v29 }
  0x4b   :  { %772 = vmatmul.mubr.bf16.gmra.mrb[12].mxu0 %v882_v30 }
  0x4c   :  { %821 = vmatmul.mubr.bf16.gmra.mrb[12].mxu1 %v884_v31 }
  0xf6   :  { %v994_v32 = vpop.f32.mrb[0].mxu0 }
  0xf7   :  { %v1022_v33 = vpop.f32.mrb[0].mxu1  ;;  %v995_v35 = vpop.f32.mrb[1].mxu0 }
  0xf8   :  { %v996_v36 = vadd.f32 %v995_v35, %v994_v32  ;;  %v1023_v37 = vpop.f32.mrb[1].mxu1  ;;  %v997_v38 = vpop.f32.mrb[2].mxu0  ;;  %v964_v32 = vunpack.c.l.bf16 %v976_v23 }
  0xf9   :  { %v1024_v39 = vadd.f32 %v1023_v37, %v1022_v33  ;;  %v1025_v40 = vpop.f32.mrb[2].mxu1  ;;  %v998_v41 = vpop.f32.mrb[3].mxu0 }
  0xfa   :  { %v668_v42 = vadd.f32 %v996_v36, %v869_v34  ;;  %v999_v43 = vadd.f32 %v998_v41, %v997_v38  ;;  %v1026_v44 = vpop.f32.mrb[3].mxu1 }
  0xfb   :  { %v1027_v45 = vadd.f32 %v1026_v44, %v1025_v40 }
  0xfc   :  { %v717_v46 = vadd.f32 %v1024_v39, %v668_v42  ;;  %v671_v47 = vadd.f32 %v999_v43, %v869_v34  ;;  %v965_v42 = vunpack.c.h.bf16 %v976_v23 }
  0xfe   :  { %v720_v48 = vadd.f32 %v1027_v45, %v671_v47  ;;  %v1000_v49 = vpop.f32.mrb[4].mxu0 }
  0xff   :  { %v1001_v50 = vpop.f32.mrb[5].mxu0  ;;  %v1028_v56 = vpop.f32.mrb[4].mxu1 }
 0x100   :  { %v1002_v51 = vadd.f32 %v1001_v50, %v1000_v49  ;;  %v1003_v52 = vpop.f32.mrb[6].mxu0  ;;  %v1029_v57 = vpop.f32.mrb[5].mxu1 }
 0x101   :  { %v1004_v53 = vpop.f32.mrb[7].mxu0  ;;  %v1030_v59 = vadd.f32 %v1029_v57, %v1028_v56  ;;  %v1031_v60 = vpop.f32.mrb[6].mxu1 }
 0x102   :  { %v1005_v54 = vadd.f32 %v1004_v53, %v1003_v52  ;;  %v676_v55 = vadd.f32 %v1002_v51, %v869_v34  ;;  %v1032_v61 = vpop.f32.mrb[7].mxu1 }
 0x103   :  { %v1033_v63 = vadd.f32 %v1032_v61, %v1031_v60 }
 0x104   :  { %v679_v58 = vadd.f32 %v1005_v54, %v869_v34  ;;  %v725_v62 = vadd.f32 %v1030_v59, %v676_v55 }
 0x106   :  { %v728_v0 = vadd.f32 %v1033_v63, %v679_v58 }
 0x116   :  { %v1050_v1 = vpop.f32.mrb[8].mxu0 }
 0x117   :  { %v1078_v2 = vpop.f32.mrb[8].mxu1  ;;  %v1051_v3 = vpop.f32.mrb[9].mxu0 }
 0x118   :  { %v1079_v4 = vpop.f32.mrb[9].mxu1  ;;  %v1052_v6 = vadd.f32 %v1051_v3, %v1050_v1  ;;  %v1053_v8 = vpop.f32.mrb[10].mxu0 }
 0x119   :  { %v1080_v7 = vadd.f32 %v1079_v4, %v1078_v2  ;;  %v1081_v9 = vpop.f32.mrb[10].mxu1  ;;  %v1054_v10 = vpop.f32.mrb[11].mxu0 }
 0x11a   :  { %v1082_v11 = vpop.f32.mrb[11].mxu1  ;;  %v766_v12 = vadd.f32 %v1052_v6, %v717_v46  ;;  %v1055_v14 = vadd.f32 %v1054_v10, %v1053_v8 }
 0x11b   :  { %v1083_v15 = vadd.f32 %v1082_v11, %v1081_v9 }
 0x11c   :  { %v815_v16 = vadd.f32 %v1080_v7, %v766_v12  ;;  %v769_v17 = vadd.f32 %v1055_v14, %v720_v48 }
 0x11e   :  { %v837_v19 = vadd.f32 %v960_v13, %v815_v16  ;;  %v818_v20 = vadd.f32 %v1083_v15, %v769_v17  ;;  %v1056_v21 = vpop.f32.mrb[12].mxu0 }
 0x11f   :  { %v1084_v22 = vpop.f32.mrb[12].mxu1  ;;  %v1057_v24 = vpop.f32.mrb[13].mxu0 }
 0x120   :  { %v1085_v25 = vpop.f32.mrb[13].mxu1  ;;  %v838_v26 = vadd.f32 %v961_v18, %v818_v20  ;;  %v1058_v27 = vadd.f32 %v1057_v24, %v1056_v21  ;;  %v1059_v29 = vpop.f32.mrb[14].mxu0  ;;  %v841_v31 = vmax.f32 %v837_v19, 0.0 }
 0x121   :  { %v1086_v28 = vadd.f32 %v1085_v25, %v1084_v22  ;;  %v1087_v30 = vpop.f32.mrb[14].mxu1  ;;  %v1060_v33 = vpop.f32.mrb[15].mxu0 }
 0x122   :  { %v1088_v34 = vpop.f32.mrb[15].mxu1  ;;  %v842_v35 = vmax.f32 %v838_v26, 0.0  ;;  %v774_v36 = vadd.f32 %v1058_v27, %v725_v62  ;;  %v1061_v37 = vadd.f32 %v1060_v33, %v1059_v29 }
 0x123   :  { %v1089_v38 = vadd.f32 %v1088_v34, %v1087_v30 }
 0x124   :  { %v969_v39 = vpack.c.bf16 %v842_v35, %v841_v31  ;;  %v823_v40 = vadd.f32 %v1086_v28, %v774_v36  ;;  %v777_v41 = vadd.f32 %v1061_v37, %v728_v0 }
 0x126   :  { %970 = vst [vmem:[%s1438_s4] sm:$0xff] %v969_v39   ;;  %v839_v43 = vadd.f32 %v964_v32, %v823_v40  ;;  %v826_v44 = vadd.f32 %v1089_v38, %v777_v41 }
 0x128   :  { %v840_v45 = vadd.f32 %v965_v42, %v826_v44  ;;  %v843_v46 = vmax.f32 %v839_v43, 0.0 }
 0x12a   :  { %v844_v47 = vmax.f32 %v840_v45, 0.0 }
 0x12c   :  { %v974_v48 = vpack.c.bf16 %v844_v47, %v843_v46 }
 0x12e   :  { %977 = vst [vmem:[%s1438_s4 + $0x8] sm:$0xff] %v974_v48  }

// kernel: resnet_classifier_forward.13
= control target key start
LH: loop header
LB: loop body
LE: loop exit
PB: predicated region body
PF: predicated region fallthrough
CT: control target
= control target key end

     0   :  { %s2050_s1 = inlined_call_operand.vmem [shape: bf16[1024,256], index: 1, kind: input, shape index: {}]   ;;  %s2051_s0 = inlined_call_operand.vmem [shape: bf16[32,1024], index: 0, kind: input, shape index: {}]   ;;  %s2052_s2 = inlined_call_operand.vmem [shape: f32[1,256], index: 2, kind: input, shape index: {}]   ;;  %s2053_s4 = inlined_call_operand.vmem [shape: bf16[32,128], index: 4, kind: output, shape index: {1}]   ;;  %s2054_s3 = inlined_call_operand.vmem [shape: bf16[32,128], index: 3, kind: output, shape index: {0}]  }
   0x1   :  { %v1370_v0 = vld [vmem:[%s2050_s1 + $0x4] ss:$8 sps:$4 sm:$0xff]   ;;  %v1374_v2 = vld [vmem:[%s2050_s1] ss:$8 sps:$4 sm:$0xff]   ;;  %v1376_v4 = vld [vmem:[%s2050_s1 + $0x14] ss:$8 sps:$4 sm:$0xff]  }
   0x2   :  { %v1372_v1 = vld [vmem:[%s2050_s1 + $0x204] ss:$8 sps:$4 sm:$0xff]   ;;  %892 = vmatprep.subr.bf16.mxu1 %v1370_v0  ;;  %v1375_v3 = vld [vmem:[%s2050_s1 + $0x200] ss:$8 sps:$4 sm:$0xff]   ;;  %v1378_v5 = vld [vmem:[%s2050_s1 + $0x214] ss:$8 sps:$4 sm:$0xff]  }
   0x3   :  { %998 = vmatprep.subr.bf16.mxu0 %v1372_v1  ;;  %893 = vmatpush1.bf16.msra.mxu1 %v1374_v2  ;;  %v1380_v6 = vld [vmem:[%s2050_s1 + $0x10] ss:$8 sps:$4 sm:$0xff]   ;;  %v1382_v8 = vld [vmem:[%s2050_s1 + $0x24] ss:$8 sps:$4 sm:$0xff]   ;;  %v1386_v10 = vld [vmem:[%s2050_s1 + $0x20] ss:$8 sps:$4 sm:$0xff]  }
   0x4   :  { %999 = vmatpush1.bf16.msra.mxu0 %v1375_v3  ;;  %894 = vmatprep.subr.bf16.mxu1 %v1376_v4  ;;  %v1381_v7 = vld [vmem:[%s2050_s1 + $0x210] ss:$8 sps:$4 sm:$0xff]   ;;  %v1384_v9 = vld [vmem:[%s2050_s1 + $0x224] ss:$8 sps:$4 sm:$0xff]   ;;  %v1387_v11 = vld [vmem:[%s2050_s1 + $0x220] ss:$8 sps:$4 sm:$0xff]  }
   0x5   :  { %1000 = vmatprep.subr.bf16.mxu0 %v1378_v5  ;;  %v1388_v12 = vld [vmem:[%s2050_s1 + $0x34] ss:$8 sps:$4 sm:$0xff]   ;;  %v1392_v14 = vld [vmem:[%s2050_s1 + $0x30] ss:$8 sps:$4 sm:$0xff]   ;;  %v1394_v16 = vld [vmem:[%s2050_s1 + $0x44] ss:$8 sps:$4 sm:$0xff]  }
   0x6   :  { %v1390_v13 = vld [vmem:[%s2050_s1 + $0x234] ss:$8 sps:$4 sm:$0xff]   ;;  %v1393_v15 = vld [vmem:[%s2050_s1 + $0x230] ss:$8 sps:$4 sm:$0xff]   ;;  %v1396_v17 = vld [vmem:[%s2050_s1 + $0x244] ss:$8 sps:$4 sm:$0xff]  }
   0x7   :  { %895 = vmatpush1.bf16.msra.mxu1 %v1380_v6  ;;  %v1398_v18 = vld [vmem:[%s2050_s1 + $0x40] ss:$8 sps:$4 sm:$0xff]   ;;  %v1400_v20 = vld [vmem:[%s2050_s1 + $0x54] ss:$8 sps:$4 sm:$0xff]   ;;  %v1404_v22 = vld [vmem:[%s2050_s1 + $0x50] ss:$8 sps:$4 sm:$0xff]  }
   0x8   :  { %1001 = vmatpush1.bf16.msra.mxu0 %v1381_v7  ;;  %896 = vmatprep.subr.bf16.mxu1 %v1382_v8  ;;  %v1399_v19 = vld [vmem:[%s2050_s1 + $0x240] ss:$8 sps:$4 sm:$0xff]   ;;  %v1402_v21 = vld [vmem:[%s2050_s1 + $0x254] ss:$8 sps:$4 sm:$0xff]   ;;  %v1405_v23 = vld [vmem:[%s2050_s1 + $0x250] ss:$8 sps:$4 sm:$0xff]  }
   0x9   :  { %1002 = vmatprep.subr.bf16.mxu0 %v1384_v9  ;;  %v1406_v24 = vld [vmem:[%s2050_s1 + $0x64] ss:$8 sps:$4 sm:$0xff]   ;;  %v1410_v26 = vld [vmem:[%s2050_s1 + $0x60] ss:$8 sps:$4 sm:$0xff]   ;;  %v1412_v28 = vld [vmem:[%s2050_s1 + $0x74] ss:$8 sps:$4 sm:$0xff]  }
   0xa   :  { %v1408_v25 = vld [vmem:[%s2050_s1 + $0x264] ss:$8 sps:$4 sm:$0xff]   ;;  %v1411_v27 = vld [vmem:[%s2050_s1 + $0x260] ss:$8 sps:$4 sm:$0xff]   ;;  %v1414_v29 = vld [vmem:[%s2050_s1 + $0x274] ss:$8 sps:$4 sm:$0xff]  }
   0xb   :  { %897 = vmatpush1.bf16.msra.mxu1 %v1386_v10  ;;  %v1416_v30 = vld [vmem:[%s2050_s1 + $0x70] ss:$8 sps:$4 sm:$0xff]   ;;  %v1418_v32 = vld [vmem:[%s2050_s1 + $0x84] ss:$8 sps:$4 sm:$0xff]   ;;  %v1422_v34 = vld [vmem:[%s2050_s1 + $0x80] ss:$8 sps:$4 sm:$0xff]  }
   0xc   :  { %1003 = vmatpush1.bf16.msra.mxu0 %v1387_v11  ;;  %898 = vmatprep.subr.bf16.mxu1 %v1388_v12  ;;  %v1417_v31 = vld [vmem:[%s2050_s1 + $0x270] ss:$8 sps:$4 sm:$0xff]   ;;  %v1420_v33 = vld [vmem:[%s2050_s1 + $0x284] ss:$8 sps:$4 sm:$0xff]   ;;  %v1423_v35 = vld [vmem:[%s2050_s1 + $0x280] ss:$8 sps:$4 sm:$0xff]  }
   0xd   :  { %1004 = vmatprep.subr.bf16.mxu0 %v1390_v13  ;;  %v1424_v36 = vld [vmem:[%s2050_s1 + $0x94] ss:$8 sps:$4 sm:$0xff]   ;;  %v1428_v38 = vld [vmem:[%s2050_s1 + $0x90] ss:$8 sps:$4 sm:$0xff]   ;;  %v1430_v40 = vld [vmem:[%s2050_s1 + $0xa4] ss:$8 sps:$4 sm:$0xff]  }
   0xe   :  { %v1426_v37 = vld [vmem:[%s2050_s1 + $0x294] ss:$8 sps:$4 sm:$0xff]   ;;  %v1429_v39 = vld [vmem:[%s2050_s1 + $0x290] ss:$8 sps:$4 sm:$0xff]   ;;  %v1432_v41 = vld [vmem:[%s2050_s1 + $0x2a4] ss:$8 sps:$4 sm:$0xff]  }
   0xf   :  { %899 = vmatpush1.bf16.msra.mxu1 %v1392_v14  ;;  %v1434_v42 = vld [vmem:[%s2050_s1 + $0xa0] ss:$8 sps:$4 sm:$0xff]   ;;  %v1436_v44 = vld [vmem:[%s2050_s1 + $0xb4] ss:$8 sps:$4 sm:$0xff]   ;;  %v1440_v46 = vld [vmem:[%s2050_s1 + $0xb0] ss:$8 sps:$4 sm:$0xff]  }
  0x10   :  { %1005 = vmatpush1.bf16.msra.mxu0 %v1393_v15  ;;  %900 = vmatprep.subr.bf16.mxu1 %v1394_v16  ;;  %v1435_v43 = vld [vmem:[%s2050_s1 + $0x2a0] ss:$8 sps:$4 sm:$0xff]   ;;  %v1438_v45 = vld [vmem:[%s2050_s1 + $0x2b4] ss:$8 sps:$4 sm:$0xff]   ;;  %v1441_v47 = vld [vmem:[%s2050_s1 + $0x2b0] ss:$8 sps:$4 sm:$0xff]  }
  0x11   :  { %1006 = vmatprep.subr.bf16.mxu0 %v1396_v17  ;;  %v16_v48 = vld [vmem:[%s2051_s0] sm:$0xff]  ;;  %v18_v53 = vld [vmem:[%s2051_s0 + $0x10] sm:$0xff] }
  0x12   :  { %v20_v49 = vld [vmem:[%s2051_s0 + $0x20] sm:$0xff]  ;;  %v22_v54 = vld [vmem:[%s2051_s0 + $0x30] sm:$0xff] }
  0x13   :  { %901 = vmatpush1.bf16.msra.mxu1 %v1398_v18  ;;  %v1442_v50 = vld [vmem:[%s2050_s1 + $0xc4] ss:$8 sps:$4 sm:$0xff]   ;;  %v1157_v52 = vcombine.high %v16_v48, %v20_v49  ;;  %v1161_v55 = vcombine.high %v18_v53, %v22_v54  ;;  %v1446_v56 = vld [vmem:[%s2050_s1 + $0xc0] ss:$8 sps:$4 sm:$0xff]   ;;  %v1448_v58 = vld [vmem:[%s2050_s1 + $0xd4] ss:$8 sps:$4 sm:$0xff]   ;;  %v1156_v8 = vcombine.low %v16_v48, %v20_v49  ;;  %v1160_v10 = vcombine.low %v18_v53, %v22_v54 }
  0x14   :  { %1007 = vmatpush1.bf16.msra.mxu0 %v1399_v19  ;;  %902 = vmatprep.subr.bf16.mxu1 %v1400_v20  ;;  %v1444_v51 = vld [vmem:[%s2050_s1 + $0x2c4] ss:$8 sps:$4 sm:$0xff]   ;;  %v1447_v57 = vld [vmem:[%s2050_s1 + $0x2c0] ss:$8 sps:$4 sm:$0xff]   ;;  %v1450_v59 = vld [vmem:[%s2050_s1 + $0x2d4] ss:$8 sps:$4 sm:$0xff]  }
  0x15   :  { %1008 = vmatprep.subr.bf16.mxu0 %v1402_v21  ;;  %924 = vmatprep.mubr.bf16.mxu1 %v1157_v52  ;;  %v1452_v60 = vld [vmem:[%s2050_s1 + $0xd0] ss:$8 sps:$4 sm:$0xff]   ;;  %v1454_v62 = vld [vmem:[%s2050_s1 + $0xe4] ss:$8 sps:$4 sm:$0xff]   ;;  %v1458_v0 = vld [vmem:[%s2050_s1 + $0xe0] ss:$8 sps:$4 sm:$0xff]  }
  0x16   :  { %1030 = vmatprep.mubr.bf16.mxu0 %v1161_v55  ;;  %v1453_v61 = vld [vmem:[%s2050_s1 + $0x2d0] ss:$8 sps:$4 sm:$0xff]   ;;  %v1456_v63 = vld [vmem:[%s2050_s1 + $0x2e4] ss:$8 sps:$4 sm:$0xff]   ;;  %v1459_v1 = vld [vmem:[%s2050_s1 + $0x2e0] ss:$8 sps:$4 sm:$0xff]  }
  0x17   :  { %903 = vmatpush1.bf16.msra.mxu1 %v1404_v22  ;;  %v1460_v2 = vld [vmem:[%s2050_s1 + $0xf4] ss:$8 sps:$4 sm:$0xff]   ;;  %v1464_v4 = vld [vmem:[%s2050_s1 + $0xf0] ss:$8 sps:$4 sm:$0xff]   ;;  %v1468_v6 = vld [vmem:[%s2050_s1 + $0x104] ss:$8 sps:$4 sm:$0xff]  }
  0x18   :  { %1009 = vmatpush1.bf16.msra.mxu0 %v1405_v23  ;;  %904 = vmatprep.subr.bf16.mxu1 %v1406_v24  ;;  %v1462_v3 = vld [vmem:[%s2050_s1 + $0x2f4] ss:$8 sps:$4 sm:$0xff]   ;;  %v1465_v5 = vld [vmem:[%s2050_s1 + $0x2f0] ss:$8 sps:$4 sm:$0xff]   ;;  %v1471_v7 = vld [vmem:[%s2050_s1 + $0x304] ss:$8 sps:$4 sm:$0xff]  }
  0x19   :  { %1010 = vmatprep.subr.bf16.mxu0 %v1408_v25  ;;  %v1466_v9 = vld [vmem:[%s2050_s1 + $0x100] ss:$8 sps:$4 sm:$0xff]   ;;  %v1474_v12 = vld [vmem:[%s2050_s1 + $0x114] ss:$8 sps:$4 sm:$0xff]   ;;  %v1472_v14 = vld [vmem:[%s2050_s1 + $0x110] ss:$8 sps:$4 sm:$0xff]  }
  0x1a   :  { %v1469_v11 = vld [vmem:[%s2050_s1 + $0x300] ss:$8 sps:$4 sm:$0xff]   ;;  %v1477_v13 = vld [vmem:[%s2050_s1 + $0x314] ss:$8 sps:$4 sm:$0xff]   ;;  %v1475_v15 = vld [vmem:[%s2050_s1 + $0x310] ss:$8 sps:$4 sm:$0xff]  }
  0x1b   :  { %905 = vmatpush1.bf16.msra.mxu1 %v1410_v26  ;;  %v1480_v16 = vld [vmem:[%s2050_s1 + $0x124] ss:$8 sps:$4 sm:$0xff]   ;;  %v1478_v18 = vld [vmem:[%s2050_s1 + $0x120] ss:$8 sps:$4 sm:$0xff]   ;;  %v1486_v20 = vld [vmem:[%s2050_s1 + $0x134] ss:$8 sps:$4 sm:$0xff]  }
  0x1c   :  { %1011 = vmatpush1.bf16.msra.mxu0 %v1411_v27  ;;  %906 = vmatprep.subr.bf16.mxu1 %v1412_v28  ;;  %v1483_v17 = vld [vmem:[%s2050_s1 + $0x324] ss:$8 sps:$4 sm:$0xff]   ;;  %v1481_v19 = vld [vmem:[%s2050_s1 + $0x320] ss:$8 sps:$4 sm:$0xff]   ;;  %v1489_v21 = vld [vmem:[%s2050_s1 + $0x334] ss:$8 sps:$4 sm:$0xff]  }
  0x1d   :  { %1012 = vmatprep.subr.bf16.mxu0 %v1414_v29  ;;  %v1484_v22 = vld [vmem:[%s2050_s1 + $0x130] ss:$8 sps:$4 sm:$0xff]   ;;  %v1492_v24 = vld [vmem:[%s2050_s1 + $0x144] ss:$8 sps:$4 sm:$0xff]   ;;  %v1490_v26 = vld [vmem:[%s2050_s1 + $0x140] ss:$8 sps:$4 sm:$0xff]  }
  0x1e   :  { %v1487_v23 = vld [vmem:[%s2050_s1 + $0x330] ss:$8 sps:$4 sm:$0xff]   ;;  %v1495_v25 = vld [vmem:[%s2050_s1 + $0x344] ss:$8 sps:$4 sm:$0xff]   ;;  %v1493_v27 = vld [vmem:[%s2050_s1 + $0x340] ss:$8 sps:$4 sm:$0xff]  }
  0x1f   :  { %907 = vmatpush1.bf16.msra.mxu1 %v1416_v30  ;;  %v1498_v28 = vld [vmem:[%s2050_s1 + $0x154] ss:$8 sps:$4 sm:$0xff]   ;;  %v24_v30 = vld [vmem:[%s2051_s0 + $0x40] sm:$0xff]  ;;  %v1508_v52 = vld [vmem:[%s2050_s1 + $0x170] ss:$8 sps:$4 sm:$0xff]  }
  0x20   :  { %1013 = vmatpush1.bf16.msra.mxu0 %v1417_v31  ;;  %908 = vmatprep.subr.bf16.mxu1 %v1418_v32  ;;  %v1501_v29 = vld [vmem:[%s2050_s1 + $0x354] ss:$8 sps:$4 sm:$0xff]   ;;  %v28_v31 = vld [vmem:[%s2051_s0 + $0x60] sm:$0xff]  ;;  %v1511_v53 = vld [vmem:[%s2050_s1 + $0x370] ss:$8 sps:$4 sm:$0xff]  }
  0x21   :  { %1014 = vmatprep.subr.bf16.mxu0 %v1420_v33  ;;  %v1165_v32 = vcombine.high %v24_v30, %v28_v31  ;;  %v26_v33 = vld [vmem:[%s2051_s0 + $0x50] sm:$0xff]  ;;  %v1516_v54 = vld [vmem:[%s2050_s1 + $0x184] ss:$8 sps:$4 sm:$0xff]  }
  0x22   :  { %v1513_v48 = vld [vmem:[%s2050_s1 + $0x374] ss:$8 sps:$4 sm:$0xff]   ;;  %v1519_v55 = vld [vmem:[%s2050_s1 + $0x384] ss:$8 sps:$4 sm:$0xff]  }
  0x23   :  { %909 = vmatpush1.bf16.msra.mxu1 %v1422_v34  ;;  %v30_v34 = vld [vmem:[%s2051_s0 + $0x70] sm:$0xff] }
  0x24   :  { %1015 = vmatpush1.bf16.msra.mxu0 %v1423_v35  ;;  %910 = vmatprep.subr.bf16.mxu1 %v1424_v36  ;;  %v1496_v35 = vld [vmem:[%s2050_s1 + $0x150] ss:$8 sps:$4 sm:$0xff]  }
  0x25   :  { %1016 = vmatprep.subr.bf16.mxu0 %v1426_v37  ;;  %v1499_v36 = vld [vmem:[%s2050_s1 + $0x350] ss:$8 sps:$4 sm:$0xff]   ;;  %v1169_v37 = vcombine.high %v26_v33, %v30_v34 }
  0x27   :  { %911 = vmatpush1.bf16.msra.mxu1 %v1428_v38  ;;  %v1164_v38 = vcombine.low %v24_v30, %v28_v31 }
  0x28   :  { %1017 = vmatpush1.bf16.msra.mxu0 %v1429_v39  ;;  %912 = vmatprep.subr.bf16.mxu1 %v1430_v40  ;;  %v1168_v39 = vcombine.low %v26_v33, %v30_v34  ;;  %v1504_v40 = vld [vmem:[%s2050_s1 + $0x164] ss:$8 sps:$4 sm:$0xff]  }
  0x29   :  { %1018 = vmatprep.subr.bf16.mxu0 %v1432_v41  ;;  %v1507_v41 = vld [vmem:[%s2050_s1 + $0x364] ss:$8 sps:$4 sm:$0xff]  }
  0x2b   :  { %913 = vmatpush1.bf16.msra.mxu1 %v1434_v42  ;;  %v1502_v42 = vld [vmem:[%s2050_s1 + $0x160] ss:$8 sps:$4 sm:$0xff]  }
  0x2c   :  { %1019 = vmatpush1.bf16.msra.mxu0 %v1435_v43  ;;  %914 = vmatprep.subr.bf16.mxu1 %v1436_v44  ;;  %v1505_v43 = vld [vmem:[%s2050_s1 + $0x360] ss:$8 sps:$4 sm:$0xff]  }
  0x2d   :  { %1020 = vmatprep.subr.bf16.mxu0 %v1438_v45  ;;  %v1890_v44 = vld [vmem:[%s2051_s0 + $0x8] sm:$0xff] }
  0x2e   :  { %v1895_v45 = vld [vmem:[%s2051_s0 + $0x28] sm:$0xff] }
  0x2f   :  { %915 = vmatpush1.bf16.msra.mxu1 %v1440_v46  ;;  %v1900_v46 = vld [vmem:[%s2051_s0 + $0x18] sm:$0xff]  ;;  %v1159_v49 = vcombine.high %v1890_v44, %v1895_v45 }
  0x30   :  { %1021 = vmatpush1.bf16.msra.mxu0 %v1441_v47  ;;  %916 = vmatprep.subr.bf16.mxu1 %v1442_v50  ;;  %v1510_v47 = vld [vmem:[%s2050_s1 + $0x174] ss:$8 sps:$4 sm:$0xff]  }
  0x31   :  { %1022 = vmatprep.subr.bf16.mxu0 %v1444_v51  ;;  %v1913_v50 = vld [vmem:[%s2051_s0 + $0x38] sm:$0xff] }
  0x32   :  { %v1163_v51 = vcombine.high %v1900_v46, %v1913_v50 }
  0x33   :  { %917 = vmatpush1.bf16.msra.mxu1 %v1446_v56  ;;  %v1514_v56 = vld [vmem:[%s2050_s1 + $0x180] ss:$8 sps:$4 sm:$0xff]  }
  0x34   :  { %1023 = vmatpush1.bf16.msra.mxu0 %v1447_v57  ;;  %918 = vmatprep.subr.bf16.mxu1 %v1448_v58  ;;  %v1517_v57 = vld [vmem:[%s2050_s1 + $0x380] ss:$8 sps:$4 sm:$0xff]   ;;  %v1522_v58 = vld [vmem:[%s2050_s1 + $0x194] ss:$8 sps:$4 sm:$0xff]  }
  0x35   :  { %1024 = vmatprep.subr.bf16.mxu0 %v1450_v59  ;;  %v1525_v59 = vld [vmem:[%s2050_s1 + $0x394] ss:$8 sps:$4 sm:$0xff]  }
  0x37   :  { %919 = vmatpush1.bf16.msra.mxu1 %v1452_v60  ;;  %v1520_v60 = vld [vmem:[%s2050_s1 + $0x190] ss:$8 sps:$4 sm:$0xff]  }
  0x38   :  { %1025 = vmatpush1.bf16.msra.mxu0 %v1453_v61  ;;  %920 = vmatprep.subr.bf16.mxu1 %v1454_v62  ;;  %v1523_v61 = vld [vmem:[%s2050_s1 + $0x390] ss:$8 sps:$4 sm:$0xff]   ;;  %v1528_v62 = vld [vmem:[%s2050_s1 + $0x1a4] ss:$8 sps:$4 sm:$0xff]  }
  0x39   :  { %1026 = vmatprep.subr.bf16.mxu0 %v1456_v63  ;;  %v1531_v63 = vld [vmem:[%s2050_s1 + $0x3a4] ss:$8 sps:$4 sm:$0xff]  }
  0x3b   :  { %921 = vmatpush1.bf16.msra.mxu1 %v1458_v0  ;;  %v1526_v0 = vld [vmem:[%s2050_s1 + $0x1a0] ss:$8 sps:$4 sm:$0xff]  }
  0x3c   :  { %1027 = vmatpush1.bf16.msra.mxu0 %v1459_v1  ;;  %922 = vmatprep.subr.bf16.mxu1 %v1460_v2  ;;  %v1529_v1 = vld [vmem:[%s2050_s1 + $0x3a0] ss:$8 sps:$4 sm:$0xff]   ;;  %v1534_v2 = vld [vmem:[%s2050_s1 + $0x1b4] ss:$8 sps:$4 sm:$0xff]  }
  0x3d   :  { %1028 = vmatprep.subr.bf16.mxu0 %v1462_v3  ;;  %v1537_v3 = vld [vmem:[%s2050_s1 + $0x3b4] ss:$8 sps:$4 sm:$0xff]  }
  0x3f   :  { %923 = vmatpush1.bf16.msra.mxu1 %v1464_v4  ;;  %v1532_v4 = vld [vmem:[%s2050_s1 + $0x1b0] ss:$8 sps:$4 sm:$0xff]  }
  0x40   :  { %1029 = vmatpush1.bf16.msra.mxu0 %v1465_v5  ;;  %945 = vmatprep.subr.bf16.mxu1 %v1468_v6  ;;  %v1535_v5 = vld [vmem:[%s2050_s1 + $0x3b0] ss:$8 sps:$4 sm:$0xff]   ;;  %v1540_v6 = vld [vmem:[%s2050_s1 + $0x1c4] ss:$8 sps:$4 sm:$0xff]  }
  0x41   :  { %1051 = vmatprep.subr.bf16.mxu0 %v1471_v7  ;;  %v1543_v7 = vld [vmem:[%s2050_s1 + $0x3c4] ss:$8 sps:$4 sm:$0xff]  }
  0x42   :  { %925 = vmatmul.mubr.bf16.vlgmr.msra.gmra.mrb[0].mxu1 %v1156_v8  ;;  %v1538_v8 = vld [vmem:[%s2050_s1 + $0x1c0] ss:$8 sps:$4 sm:$0xff]  }
  0x43   :  { %1031 = vmatmul.mubr.bf16.vlgmr.msra.gmra.mrb[0].mxu0 %v1160_v10  ;;  %946 = vmatpush1.bf16.msra.mxu1 %v1466_v9  ;;  %v1541_v9 = vld [vmem:[%s2050_s1 + $0x3c0] ss:$8 sps:$4 sm:$0xff]   ;;  %v1546_v10 = vld [vmem:[%s2050_s1 + $0x1d4] ss:$8 sps:$4 sm:$0xff]  }
  0x44   :  { %1052 = vmatpush1.bf16.msra.mxu0 %v1469_v11  ;;  %947 = vmatprep.subr.bf16.mxu1 %v1474_v12  ;;  %v1549_v11 = vld [vmem:[%s2050_s1 + $0x3d4] ss:$8 sps:$4 sm:$0xff]   ;;  %v1544_v12 = vld [vmem:[%s2050_s1 + $0x1d0] ss:$8 sps:$4 sm:$0xff]  }
  0x45   :  { %1053 = vmatprep.subr.bf16.mxu0 %v1477_v13  ;;  %934 = vmatprep.mubr.bf16.mxu1 %v1165_v32  ;;  %v1547_v13 = vld [vmem:[%s2050_s1 + $0x3d0] ss:$8 sps:$4 sm:$0xff]   ;;  %v162_v32 = vlaneseq }
  0x46   :  { %1040 = vmatprep.mubr.bf16.mxu0 %v1169_v37 }
  0x47   :  { %948 = vmatpush1.bf16.msra.mxu1 %v1472_v14  ;;  %v1552_v14 = vld [vmem:[%s2050_s1 + $0x1e4] ss:$8 sps:$4 sm:$0xff]   ;;  %v163_v33 = vshrl.u32 %v162_v32, 7 }
  0x48   :  { %1054 = vmatpush1.bf16.msra.mxu0 %v1475_v15  ;;  %949 = vmatprep.subr.bf16.mxu1 %v1480_v16  ;;  %v1555_v15 = vld [vmem:[%s2050_s1 + $0x3e4] ss:$8 sps:$4 sm:$0xff]   ;;  %v1550_v16 = vld [vmem:[%s2050_s1 + $0x1e0] ss:$8 sps:$4 sm:$0xff]  }
  0x49   :  { %1055 = vmatprep.subr.bf16.mxu0 %v1483_v17  ;;  %v1553_v17 = vld [vmem:[%s2050_s1 + $0x3e0] ss:$8 sps:$4 sm:$0xff]   ;;  %v164_v34 = vsub.s32 0, %v163_v33 }
  0x4a   :  { %935 = vmatmul.mubr.bf16.gmra.mrb[4].mxu1 %v1164_v38 }
  0x4b   :  { %950 = vmatpush1.bf16.msra.mxu1 %v1478_v18  ;;  %1041 = vmatmul.mubr.bf16.gmra.mrb[4].mxu0 %v1168_v39  ;;  %v1558_v18 = vld [vmem:[%s2050_s1 + $0x1f4] ss:$8 sps:$4 sm:$0xff]  }
  0x4c   :  { %1056 = vmatpush1.bf16.msra.mxu0 %v1481_v19  ;;  %951 = vmatprep.subr.bf16.mxu1 %v1486_v20  ;;  %v1561_v19 = vld [vmem:[%s2050_s1 + $0x3f4] ss:$8 sps:$4 sm:$0xff]   ;;  %v1556_v20 = vld [vmem:[%s2050_s1 + $0x1f0] ss:$8 sps:$4 sm:$0xff]  }
  0x4d   :  { %1057 = vmatprep.subr.bf16.mxu0 %v1489_v21  ;;  %977 = vmatprep.mubr.bf16.mxu1 %v1159_v49  ;;  %v1559_v21 = vld [vmem:[%s2050_s1 + $0x3f0] ss:$8 sps:$4 sm:$0xff]  }
  0x4e   :  { %1083 = vmatprep.mubr.bf16.mxu0 %v1163_v51 }
  0x4f   :  { %952 = vmatpush1.bf16.msra.mxu1 %v1484_v22  ;;  %v25_v22 = vld [vmem:[%s2051_s0 + $0x48] sm:$0xff] }
  0x50   :  { %1058 = vmatpush1.bf16.msra.mxu0 %v1487_v23  ;;  %953 = vmatprep.subr.bf16.mxu1 %v1492_v24  ;;  %v29_v23 = vld [vmem:[%s2051_s0 + $0x68] sm:$0xff]  ;;  %v27_v24 = vld [vmem:[%s2051_s0 + $0x58] sm:$0xff] }
  0x51   :  { %1059 = vmatprep.subr.bf16.mxu0 %v1495_v25  ;;  %v31_v25 = vld [vmem:[%s2051_s0 + $0x78] sm:$0xff]  ;;  %v1166_v30 = vcombine.low %v25_v22, %v29_v23 }
  0x52   :  { %v1170_v31 = vcombine.low %v27_v24, %v31_v25 }
  0x53   :  { %954 = vmatpush1.bf16.msra.mxu1 %v1490_v26  ;;  %v1158_v26 = vcombine.low %v1890_v44, %v1895_v45 }
  0x54   :  { %1060 = vmatpush1.bf16.msra.mxu0 %v1493_v27  ;;  %955 = vmatprep.subr.bf16.mxu1 %v1498_v28  ;;  %v1162_v27 = vcombine.low %v1900_v46, %v1913_v50  ;;  %v1167_v28 = vcombine.high %v25_v22, %v29_v23 }
  0x55   :  { %1061 = vmatprep.subr.bf16.mxu0 %v1501_v29  ;;  %v1171_v29 = vcombine.high %v27_v24, %v31_v25 }
  0x57   :  { %956 = vmatpush1.bf16.msra.mxu1 %v1496_v35  ;;  %v160_v35 = vld [vmem:[%s2052_s2] sm:$0x3] }
  0x58   :  { %1062 = vmatpush1.bf16.msra.mxu0 %v1499_v36  ;;  %957 = vmatprep.subr.bf16.mxu1 %v1504_v40  ;;  %v168_v36 = vsub.s32 1, %v163_v33  ;;  %v165_v37 = vrot.slane %v160_v35, %v164_v34 }
  0x59   :  { %1063 = vmatprep.subr.bf16.mxu0 %v1507_v41 }
  0x5a   :  { %v169_v38 = vrot.slane %v160_v35, %v168_v36 }
  0x5b   :  { %958 = vmatpush1.bf16.msra.mxu1 %v1502_v42 }
  0x5c   :  { %1064 = vmatpush1.bf16.msra.mxu0 %v1505_v43  ;;  %959 = vmatprep.subr.bf16.mxu1 %v1510_v47 }
  0x5d   :  { %1065 = vmatprep.subr.bf16.mxu0 %v1513_v48 }
  0x5f   :  { %960 = vmatpush1.bf16.msra.mxu1 %v1508_v52 }
  0x60   :  { %1066 = vmatpush1.bf16.msra.mxu0 %v1511_v53  ;;  %961 = vmatprep.subr.bf16.mxu1 %v1516_v54 }
  0x61   :  { %1067 = vmatprep.subr.bf16.mxu0 %v1519_v55 }
  0x63   :  { %962 = vmatpush1.bf16.msra.mxu1 %v1514_v56 }
  0x64   :  { %1068 = vmatpush1.bf16.msra.mxu0 %v1517_v57  ;;  %963 = vmatprep.subr.bf16.mxu1 %v1522_v58 }
  0x65   :  { %1069 = vmatprep.subr.bf16.mxu0 %v1525_v59 }
  0x67   :  { %964 = vmatpush1.bf16.msra.mxu1 %v1520_v60 }
  0x68   :  { %1070 = vmatpush1.bf16.msra.mxu0 %v1523_v61  ;;  %965 = vmatprep.subr.bf16.mxu1 %v1528_v62 }
  0x69   :  { %1071 = vmatprep.subr.bf16.mxu0 %v1531_v63 }
  0x6b   :  { %966 = vmatpush1.bf16.msra.mxu1 %v1526_v0 }
  0x6c   :  { %1072 = vmatpush1.bf16.msra.mxu0 %v1529_v1  ;;  %967 = vmatprep.subr.bf16.mxu1 %v1534_v2 }
  0x6d   :  { %1073 = vmatprep.subr.bf16.mxu0 %v1537_v3 }
  0x6f   :  { %968 = vmatpush1.bf16.msra.mxu1 %v1532_v4 }
  0x70   :  { %1074 = vmatpush1.bf16.msra.mxu0 %v1535_v5  ;;  %969 = vmatprep.subr.bf16.mxu1 %v1540_v6 }
  0x71   :  { %1075 = vmatprep.subr.bf16.mxu0 %v1543_v7 }
  0x73   :  { %970 = vmatpush1.bf16.msra.mxu1 %v1538_v8 }
  0x74   :  { %1076 = vmatpush1.bf16.msra.mxu0 %v1541_v9  ;;  %971 = vmatprep.subr.bf16.mxu1 %v1546_v10 }
  0x75   :  { %1077 = vmatprep.subr.bf16.mxu0 %v1549_v11 }
  0x77   :  { %972 = vmatpush1.bf16.msra.mxu1 %v1544_v12 }
  0x78   :  { %1078 = vmatpush1.bf16.msra.mxu0 %v1547_v13  ;;  %973 = vmatprep.subr.bf16.mxu1 %v1552_v14 }
  0x79   :  { %1079 = vmatprep.subr.bf16.mxu0 %v1555_v15 }
  0x7b   :  { %974 = vmatpush1.bf16.msra.mxu1 %v1550_v16 }
  0x7c   :  { %1080 = vmatpush1.bf16.msra.mxu0 %v1553_v17  ;;  %975 = vmatprep.subr.bf16.mxu1 %v1558_v18 }
  0x7d   :  { %1081 = vmatprep.subr.bf16.mxu0 %v1561_v19 }
  0x7f   :  { %976 = vmatpush1.bf16.msra.mxu1 %v1556_v20 }
  0x80   :  { %1082 = vmatpush1.bf16.msra.mxu0 %v1559_v21 }
  0x82   :  { %978 = vmatmul.mubr.bf16.vlgmr.msra.gmra.mrb[0].mxu1 %v1158_v26 }
  0x83   :  { %1084 = vmatmul.mubr.bf16.vlgmr.msra.gmra.mrb[0].mxu0 %v1162_v27  ;;  %987 = vmatprep.mubr.bf16.mxu1 %v1167_v28 }
  0x84   :  { %1093 = vmatprep.mubr.bf16.mxu0 %v1171_v29 }
  0x8a   :  { %988 = vmatmul.mubr.bf16.gmra.mrb[4].mxu1 %v1166_v30 }
  0x8b   :  { %1094 = vmatmul.mubr.bf16.gmra.mrb[4].mxu0 %v1170_v31 }
 0x155   :  { %v979_v39 = vpop.f32.mrb[0].mxu1 }
 0x156   :  { %v1085_v40 = vpop.f32.mrb[0].mxu0  ;;  %v1338_v41 = vadd.f32 %v979_v39, %v165_v37  ;;  %v981_v42 = vpop.f32.mrb[1].mxu1 }
 0x157   :  { %v1087_v43 = vpop.f32.mrb[1].mxu0  ;;  %v1340_v44 = vadd.f32 %v981_v42, %v169_v38  ;;  %v983_v45 = vpop.f32.mrb[2].mxu1 }
 0x158   :  { %v1089_v46 = vpop.f32.mrb[2].mxu0  ;;  %v1339_v47 = vadd.f32 %v1338_v41, %v1085_v40  ;;  %v1342_v48 = vadd.f32 %v983_v45, %v165_v37  ;;  %v985_v49 = vpop.f32.mrb[3].mxu1 }
 0x159   :  { %v1091_v50 = vpop.f32.mrb[3].mxu0  ;;  %v1341_v51 = vadd.f32 %v1340_v44, %v1087_v43  ;;  %v1344_v52 = vadd.f32 %v985_v49, %v169_v38 }
 0x15a   :  { %v1343_v53 = vadd.f32 %v1342_v48, %v1089_v46  ;;  %v1104_v55 = vmax.f32 %v1339_v47, 0.0 }
 0x15b   :  { %v1345_v54 = vadd.f32 %v1344_v52, %v1091_v50 }
 0x15c   :  { %v1105_v56 = vmax.f32 %v1343_v53, 0.0 }
 0x15d   :  { %v1329_v57 = vpack.c.bf16 %v1345_v54, %v1341_v51  ;;  %v989_v58 = vpop.f32.mrb[4].mxu1 }
 0x15e   :  { %v1095_v59 = vpop.f32.mrb[4].mxu0  ;;  %v1319_v60 = vpack.c.bf16 %v1105_v56, %v1104_v55  ;;  %v1346_v61 = vadd.f32 %v989_v58, %v165_v37  ;;  %v991_v62 = vpop.f32.mrb[5].mxu1 }
 0x15f   :  { %v1097_v63 = vpop.f32.mrb[5].mxu0  ;;  %1330 = vst [vmem:[%s2053_s4] sm:$0xff] %v1329_v57   ;;  %v1348_v0 = vadd.f32 %v991_v62, %v169_v38  ;;  %v993_v1 = vpop.f32.mrb[6].mxu1 }
 0x160   :  { %v1099_v2 = vpop.f32.mrb[6].mxu0  ;;  %1320 = vst [vmem:[%s2054_s3] sm:$0xff] %v1319_v60   ;;  %v1347_v3 = vadd.f32 %v1346_v61, %v1095_v59  ;;  %v1350_v4 = vadd.f32 %v993_v1, %v165_v37  ;;  %v995_v5 = vpop.f32.mrb[7].mxu1 }
 0x161   :  { %v1101_v6 = vpop.f32.mrb[7].mxu0  ;;  %v1349_v7 = vadd.f32 %v1348_v0, %v1097_v63  ;;  %v1352_v8 = vadd.f32 %v995_v5, %v169_v38 }
 0x162   :  { %v1351_v9 = vadd.f32 %v1350_v4, %v1099_v2  ;;  %v1106_v11 = vmax.f32 %v1347_v3, 0.0 }
 0x163   :  { %v1353_v10 = vadd.f32 %v1352_v8, %v1101_v6 }
 0x164   :  { %v1107_v12 = vmax.f32 %v1351_v9, 0.0 }
 0x165   :  { %v1334_v13 = vpack.c.bf16 %v1353_v10, %v1349_v7 }
 0x166   :  { %v1324_v14 = vpack.c.bf16 %v1107_v12, %v1106_v11 }
 0x167   :  { %1337 = vst [vmem:[%s2053_s4 + $0x8] sm:$0xff] %v1334_v13  }
 0x168   :  { %1336 = vst [vmem:[%s2054_s3 + $0x8] sm:$0xff] %v1324_v14  }

// kernel: resnet_classifier_forward.19
= control target key start
LH: loop header
LB: loop body
LE: loop exit
PB: predicated region body
PF: predicated region fallthrough
CT: control target
= control target key end

     0   :  { %vm19_vm0 = vcmask 33792   ;;  %v280_v3 = vmov 0.0|0.0   ;;  %v281_v6 = vmov 0.0   ;;  %vm282_vm1 = vmmov 0   ;;  %s376_s0 = inlined_call_operand.vmem [shape: bf16[2,16,128], index: 0, kind: input, shape index: {}]   ;;  %s377_s1 = inlined_call_operand.vmem [shape: f32[128,5], index: 1, kind: input, shape index: {}]   ;;  %s378_s2 = inlined_call_operand.vmem [shape: f32[1,5], index: 2, kind: input, shape index: {}]   ;;  %s379_s3 = inlined_call_operand.hbm [shape: f32[2,5], index: 3, kind: output, shape index: {}]  }
   0x1   :  { %v44_v0 = vld [vmem:[%s377_s1] sm:$0xff]  ;;  %v45_v1 = vld [vmem:[%s377_s1 + $0x8] sm:$0xff]  ;;  %v46_v2 = vld [vmem:[%s377_s1 + $0x10] sm:$0xff]  ;;  %228 = vmatprep.subr.bf16.mxu0 %v280_v3  ;;  %20 = vst.msk [vmem:[#allocation2] sm:$0x3] %vm19_vm0, %v281_v6  ;;  %225 = vmatprep.mubr.msk.f32.mxu0 %vm282_vm1, %v281_v6 }
   0x2   :  { %v229_v4 = vpack.c.bf16 %v45_v1, %v44_v0  ;;  %v47_v5 = vld [vmem:[%s377_s1 + $0x18] sm:$0xff]  ;;  %v48_v8 = vld [vmem:[%s377_s1 + $0x20] sm:$0xff]  ;;  %v49_v9 = vld [vmem:[%s377_s1 + $0x28] sm:$0xff] }
   0x3   :  { %v232_v7 = vpack.c.bf16 %v47_v5, %v46_v2  ;;  %v168_v10 = vld [vmem:[%s376_s0] sm:$0xff]   ;;  %v175_v11 = vld [vmem:[%s376_s0 + $0x8] sm:$0xff]  }
   0x4   :  { %230 = vmatpush3.bf16.msra.mxu0 %v229_v4  ;;  %v169_v12 = vunpack.c.l.bf16 %v168_v10  ;;  %v170_v13 = vunpack.c.h.bf16 %v168_v10  ;;  %v173_v14 = vunpack.c.l.bf16 %v175_v11 }
   0x5   :  { %231 = vmatprep.subr.bf16.mxu0 %v280_v3 }
   0x6   :  { %8 = vsyncpa [#allocation3], 0  ;;  %v235_v15 = vpack.c.bf16 %v49_v9, %v48_v8  ;;  %v174_v16 = vunpack.c.h.bf16 %v175_v11  ;;  %v50_v17 = vld [vmem:[%s377_s1 + $0x30] sm:$0xff]  ;;  %v51_v18 = vld [vmem:[%s377_s1 + $0x38] sm:$0xff]  ;;  %v29_v19 = vadd.f32 %v170_v13, %v169_v12  ;;  %vm62_vm2 = vcmask 1041409  }
   0x7   :  { %v238_v22 = vpack.c.bf16 %v51_v18, %v50_v17  ;;  %v52_v24 = vld [vmem:[%s377_s1 + $0x40] sm:$0xff]  ;;  %v53_v25 = vld [vmem:[%s377_s1 + $0x48] sm:$0xff]  ;;  %v54_v31 = vld [vmem:[%s377_s1 + $0x50] sm:$0xff] }
   0x8   :  { %233 = vmatpush3.bf16.msra.mxu0 %v232_v7  ;;  %v36_v20 = vadd.f32 %v174_v16, %v173_v14  ;;  %v30_v21 = vrot.slane %v29_v19, 4  ;;  %v241_v28 = vpack.c.bf16 %v53_v25, %v52_v24  ;;  %v55_v32 = vld [vmem:[%s377_s1 + $0x58] sm:$0xff]  ;;  %v56_v36 = vld [vmem:[%s377_s1 + $0x60] sm:$0xff]  ;;  %v57_v37 = vld [vmem:[%s377_s1 + $0x68] sm:$0xff] }
   0x9   :  { %234 = vmatprep.subr.bf16.mxu0 %v280_v3  ;;  %v244_v33 = vpack.c.bf16 %v55_v32, %v54_v31  ;;  %v247_v38 = vpack.c.bf16 %v57_v37, %v56_v36  ;;  %v58_v41 = vld [vmem:[%s377_s1 + $0x70] sm:$0xff]  ;;  %v59_v42 = vld [vmem:[%s377_s1 + $0x78] sm:$0xff]  ;;  %v43_v47 = vld [vmem:[#allocation2] sm:$0x3]  ;;  %s283_s1 = smov [#allocation2]  }
   0xa   :  { %v37_v23 = vrot.slane %v36_v20, 4  ;;  %v31_v26 = vadd.f32 %v30_v21, %v29_v19  ;;  %v250_v43 = vpack.c.bf16 %v59_v42, %v58_v41  ;;  %v166_v52 = vld [vmem:[%s378_s2] ss:$0 sm:$0xff]  ;;  %s158_s22 = sshll.u32 %s283_s1, 4  ;;  %s159_s22 = int_to_ptr.vmem [resolvable:$true] %s158_s22 }
   0xb   :  { %s256_s23 = scalar_lea.vmem %s159_s22, 32  ;;  %p261_p1 = scmp.lt.s32.totalorder %s159_s22, %s159_s22 }
   0xc   :  { %236 = vmatpush3.bf16.msra.mxu0 %v235_v15  ;;  %v38_v27 = vadd.f32 %v37_v23, %v36_v20  ;;  %v32_v29 = vrot.slane %v31_v26, 2  ;;  %p257_p0 = scmp.ne.s32.totalorder %s159_s22, %s256_s23  ;;  %p262_p2 = scmp.lt.s32.totalorder %s256_s23, %s256_s23 }
   0xd   :  { %237 = vmatprep.subr.bf16.mxu0 %v280_v3 }
   0xe   :  { %v39_v30 = vrot.slane %v38_v27, 2  ;;  %v33_v34 = vadd.f32 %v32_v29, %v31_v26  ;;  %p263_p3 = por %p262_p2, %p261_p1 }
  0x10   :  { %239 = vmatpush3.bf16.msra.mxu0 %v238_v22  ;;  %v40_v35 = vadd.f32 %v39_v30, %v38_v27  ;;  %v34_v39 = vrot.slane %v33_v34, 1  ;;  %p264_p4 = pnand %p263_p3, %p257_p0 }
  0x11   :  { %240 = vmatprep.subr.bf16.mxu0 %v280_v3 }
  0x12   :  { %v41_v40 = vrot.slane %v40_v35, 1  ;;  %v35_v44 = vadd.f32 %v34_v39, %v33_v34 }
  0x14   :  { %242 = vmatpush3.bf16.msra.mxu0 %v241_v28  ;;  %v42_v45 = vadd.f32 %v41_v40, %v40_v35 }
  0x15   :  { %243 = vmatprep.subr.bf16.mxu0 %v280_v3 }
  0x16   :  { %v63_v46 = vsel %vm62_vm2, %v42_v45, %v35_v44 }
  0x18   :  { %245 = vmatpush3.bf16.msra.mxu0 %v244_v33 }
  0x19   :  { %246 = vmatprep.subr.bf16.mxu0 %v280_v3 }
  0x1c   :  { %248 = vmatpush3.bf16.msra.mxu0 %v247_v38 }
  0x1d   :  { %249 = vmatprep.subr.bf16.mxu0 %v280_v3 }
  0x20   :  { %251 = vmatpush3.bf16.msra.mxu0 %v250_v43 }
  0x23   :  { %226 = vmatmul.mubr.f32.vlgmr.msra.gmra.mrb[0].mxu0 %v63_v46 }
  0xf6   :  { %v131_v48 = vpop.f32.mrb[0].mxu0 }
  0xf7   :  { %v135_v49 = vadd.f32 %v131_v48, %v43_v47  ;;  %v227_v50 = vpop.f32.mrb[1].mxu0 }
  0xf9   :  { %137 = vst.msk [vmem:[#allocation2] sm:$0x3] %vm19_vm0, %v135_v49 }
 0x100   :  { %v141_v51 = vld [vmem:[#allocation2] sm:$0x3] }
 0x101   :  { %v142_v53 = vmul.f32 0.0625, %v141_v51 }
 0x103   :  { %v150_v54 = vadd.f32 %v166_v52, %v142_v53 }
 0x105   :  { %151 = vst.msk [vmem:[#allocation2] sm:$0x3] %vm19_vm0, %v150_v54 }
 0x106   :  { %267 = shalt.err (!%p264_p4)
}
 0x107   :  { %s268_s26 = scalar_lea.hbm %s379_s3, 32 }
 0x108   :  { %p269_p5 = scmp.ne.s32.totalorder %s379_s3, %s268_s26  ;;  %p272_p6 = scmp.lt.u32.totalorder %s268_s26, %s379_s3 }
 0x10a   :  { %p274_p7 = pnand %p272_p6, %p269_p5 }
 0x10c   :  { %277 = shalt.err (!%p274_p7)
}
 0x10d   :  { %161 = dma.vmem_to_hbm [thread:$0]  %s159_s22, 32, %s379_s3, [#allocation3]  }
 0x10e   :  { %278 = dma.done.wait [#allocation3], 32  }
 0x10f   :  { %279 = vsyncadd [#allocation3], 4294967264 }
 0x110   :  { %165 = vsyncpa [#allocation3], 1 }

</bundles_post_ra>
